<compile_context>
chip_gen: v7x
topology: tpu7x:2x2x1
jax: 0.10.0
libtpu: 0.0.40
codegen_flags: <defaults>
</compile_context>

<pallas_src>
import functools

import jax
import jax.numpy as jnp
from jax import lax
from jax.experimental import pallas as pl
from jax.experimental.pallas import tpu as pltpu


def _round_up(x, m):
    return ((x + m - 1) // m) * m


# ---------------------------------------------------------------------------
# Fused Pallas kernel: depthwise 3x3 + BN(eval) + ReLU + pointwise 1x1
# ---------------------------------------------------------------------------
def _sepconv_kernel(x_ref, wdw_ref, scale_ref, shift_ref, wpw_ref, o_ref,
                    *, H, W, k, dilation):
    # x_ref     : (1, H+pad, W+pad, Cp) f32   spatially padded NHWC block (one batch)
    # wdw_ref   : (k*k, Cp)            f32   depthwise taps, tap-major
    # scale_ref : (1, Cp)              f32   folded BatchNorm scale (eval mode)
    # shift_ref : (1, Cp)              f32   folded BatchNorm shift
    # wpw_ref   : (Cp, Pp)             bf16  pointwise (1x1) weight
    # o_ref     : (1, H*W, Pp)         f32   NHWC output rows (lane-dense)
    Cp = wdw_ref.shape[-1]
    wdw = wdw_ref[...]

    # Depthwise conv: k*k shifted multiply-accumulates on the VPU (no im2col).
    acc = None
    for t in range(k * k):
        di, dj = divmod(t, k)
        patch = x_ref[0,
                      di * dilation:di * dilation + H,
                      dj * dilation:dj * dilation + W, :]          # (H, W, Cp)
        contrib = patch * wdw[t].reshape(1, 1, Cp)
        acc = contrib if acc is None else acc + contrib

    # BatchNorm (inference, folded to scale/shift) + ReLU, in f32.
    h = acc * scale_ref[0].reshape(1, 1, Cp) + shift_ref[0].reshape(1, 1, Cp)
    h = jnp.maximum(h, 0.0)

    # Pointwise 1x1 conv as an MXU matmul: bf16 operands, f32 accumulation.
    hm = h.reshape(H * W, Cp).astype(jnp.bfloat16)
    o_ref[0] = jnp.dot(hm, wpw_ref[...], preferred_element_type=jnp.float32)


# ---------------------------------------------------------------------------
# Host wrapper reproducing the PyTorch module forward (NCHW in, NCHW out)
# ---------------------------------------------------------------------------
def separable_conv2d2(x, params, *, kernel_size=3, dilation=1, eps=1e-5):
    B, C, H, W = x.shape
    P = params['w_pointwise'].shape[0]
    k = kernel_size
    k_eff = k + (k - 1) * (dilation - 1)
    pad_total = k_eff - 1
    pad_beg = pad_total // 2
    pad_end = pad_total - pad_beg

    Cp = _round_up(C, 128)          # lane-dense input channels
    Pp = _round_up(P, 128)          # lane-dense output channels

    # One NCHW->NHWC transpose; fixed_padding + channel zero-padding in one pad.
    x_nhwc = jnp.transpose(x, (0, 2, 3, 1))
    x_pad = jnp.pad(x_nhwc, ((0, 0), (pad_beg, pad_end), (pad_beg, pad_end),
                             (0, Cp - C)))

    # Depthwise weight (C, 1, k, k) -> tap-major (k*k, Cp); zero on padded channels.
    wdw = jnp.transpose(params['w_depthwise'][:, 0], (1, 2, 0)).reshape(k * k, C)
    wdw = jnp.pad(wdw, ((0, 0), (0, Cp - C)))

    # BatchNorm (eval) folded to per-channel scale/shift; zero on padded channels.
    scale = params['bn_gamma'] * lax.rsqrt(params['bn_var'] + eps)
    shift = params['bn_beta'] - params['bn_mean'] * scale
    scale = jnp.pad(scale, (0, Cp - C)).reshape(1, Cp)
    shift = jnp.pad(shift, (0, Cp - C)).reshape(1, Cp)

    # Pointwise weight (P, C, 1, 1) -> (Cp, Pp) bf16.
    wpw = jnp.transpose(params['w_pointwise'][:, :, 0, 0], (1, 0))
    wpw = jnp.pad(wpw, ((0, Cp - C), (0, Pp - P))).astype(jnp.bfloat16)

    Hp, Wp = H + pad_total, W + pad_total

    cost = pl.CostEstimate(
        flops=2 * B * H * W * Cp * (k * k + Pp),
        transcendentals=0,
        bytes_accessed=(x_pad.size + wdw.size + scale.size + shift.size
                        + B * H * W * Pp) * 4 + wpw.size * 2,
    )

    kernel = functools.partial(_sepconv_kernel, H=H, W=W, k=k, dilation=dilation)
    out = pl.pallas_call(
        kernel,
        out_shape=jax.ShapeDtypeStruct((B, H * W, Pp), jnp.float32),
        grid=(B,),
        in_specs=[
            pl.BlockSpec((1, Hp, Wp, Cp), lambda b: (b, 0, 0, 0)),   # per-batch block
            pl.BlockSpec((k * k, Cp), lambda b: (0, 0)),             # resident weights
            pl.BlockSpec((1, Cp), lambda b: (0, 0)),
            pl.BlockSpec((1, Cp), lambda b: (0, 0)),
            pl.BlockSpec((Cp, Pp), lambda b: (0, 0)),
        ],
        out_specs=pl.BlockSpec((1, H * W, Pp), lambda b: (b, 0, 0)),
        compiler_params=pltpu.CompilerParams(
            dimension_semantics=("parallel",)),
        cost_estimate=cost,
    )(x_pad, wdw, scale, shift, wpw)

    # Slice off channel padding; single NHWC->NCHW transpose at the very end.
    out = out[:, :, :P].reshape(B, H, W, P)
    return jnp.transpose(out, (0, 3, 1, 2))


# ---------------------------------------------------------------------------
# Deterministic parameter init (shapes from the module's __init__)
# ---------------------------------------------------------------------------
def init_params(key, inplanes, planes):
    k0, k1, k2, k3, k4, k5 = jax.random.split(key, 6)
    return {
        # conv1: Conv2d(C, C, 3, stride=1, pad=0, dilation=1, groups=C, bias=False)
        'w_depthwise': 0.1 * jax.random.normal(k0, (inplanes, 1, 3, 3), jnp.float32),
        # BatchNorm(inplanes) parameters + running stats (inference mode)
        'bn_gamma': 1.0 + 0.1 * jax.random.normal(k1, (inplanes,), jnp.float32),
        'bn_beta': 0.1 * jax.random.normal(k2, (inplanes,), jnp.float32),
        'bn_mean': 0.1 * jax.random.normal(k3, (inplanes,), jnp.float32),
        'bn_var': jnp.abs(jax.random.normal(k4, (inplanes,), jnp.float32)) + 0.5,
        # pointwise: Conv2d(inplanes, planes, 1, bias=False)
        'w_pointwise': 0.1 * jax.random.normal(k5, (planes, inplanes, 1, 1), jnp.float32),
    }


def reference(x, params, eps=1e-5):
    """Pure-JAX (XLA) reference of the PyTorch forward, for correctness check."""
    B, C, H, W = x.shape
    xp = jnp.pad(x, ((0, 0), (0, 0), (1, 1), (1, 1)))          # fixed_padding(3, 1)
    y = lax.conv_general_dilated(
        xp, params['w_depthwise'], (1, 1), 'VALID',
        feature_group_count=C,
        dimension_numbers=('NCHW', 'OIHW', 'NCHW'),
        precision=lax.Precision.HIGHEST)
    scale = params['bn_gamma'] / jnp.sqrt(params['bn_var'] + eps)
    shift = params['bn_beta'] - params['bn_mean'] * scale
    y = jnp.maximum(y * scale[None, :, None, None] + shift[None, :, None, None], 0.0)
    return lax.conv_general_dilated(
        y, params['w_pointwise'], (1, 1), 'VALID',
        dimension_numbers=('NCHW', 'OIHW', 'NCHW'),
        precision=lax.Precision.HIGHEST)


if __name__ == "__main__":
    B, C, H, W = 2, 4, 16, 16
    planes = 8

    key = jax.random.PRNGKey(0)
    kx, kp = jax.random.split(key)
    x = jax.random.normal(kx, (B, C, H, W), jnp.float32)
    params = init_params(kp, C, planes)

    fwd = jax.jit(separable_conv2d2)
    out = jax.block_until_ready(fwd(x, params))
    assert out.shape == (B, planes, H, W), out.shape
    assert bool(jnp.all(jnp.isfinite(out)))

    ref = reference(x, params)
    err = float(jnp.max(jnp.abs(out - ref)))
    assert bool(jnp.allclose(out, ref, rtol=2e-2, atol=2e-2)), err

    print("KERNEL_OK")
</pallas_src>

<mosaic_0001>
module attributes {stable_mosaic.version = 11 : i64} {
  func.func @_sepconv_kernel(%arg0: i32, %arg1: memref<1x18x18x128xf32, #tpu.memory_space<vmem>>, %arg2: memref<9x128xf32, #tpu.memory_space<vmem>>, %arg3: memref<1x128xf32, #tpu.memory_space<vmem>>, %arg4: memref<1x128xf32, #tpu.memory_space<vmem>>, %arg5: memref<128x128xbf16, #tpu.memory_space<vmem>>, %arg6: memref<1x256x128xf32, #tpu.memory_space<vmem>>) attributes {dimension_semantics = [#tpu.dimension_semantics<parallel>], iteration_bounds = array<i64: 2>, scalar_prefetch = 0 : i64, scratch_operands = 0 : i64, tpu.core_type = #tpu.core_type<tc>, window_params = [{transform_indices = @transform_0, window_bounds = array<i64: 1, 18, 18, 128>}, {pipeline_mode = #tpu.pipeline_mode<synchronous>, transform_indices = @transform_1, window_bounds = array<i64: 9, 128>}, {pipeline_mode = #tpu.pipeline_mode<synchronous>, transform_indices = @transform_2, window_bounds = array<i64: 1, 128>}, {pipeline_mode = #tpu.pipeline_mode<synchronous>, transform_indices = @transform_3, window_bounds = array<i64: 1, 128>}, {pipeline_mode = #tpu.pipeline_mode<synchronous>, transform_indices = @transform_4, window_bounds = array<i64: 128, 128>}, {transform_indices = @transform_5, window_bounds = array<i64: 1, 256, 128>}]} {
    %c0 = arith.constant 0 : index
    %c0_0 = arith.constant 0 : index
    %0 = vector.load %arg2[%c0, %c0_0] : memref<9x128xf32, #tpu.memory_space<vmem>>, vector<9x128xf32>
    %c0_1 = arith.constant 0 : index
    %c0_2 = arith.constant 0 : index
    %c0_3 = arith.constant 0 : index
    %c0_4 = arith.constant 0 : index
    %1 = vector.load %arg1[%c0_1, %c0_2, %c0_3, %c0_4] : memref<1x18x18x128xf32, #tpu.memory_space<vmem>>, vector<1x16x16x128xf32>
    %2 = vector.shape_cast %1 : vector<1x16x16x128xf32> to vector<16x16x128xf32>
    %3 = vector.extract_strided_slice %0 {offsets = [0, 0], sizes = [1, 128], strides = [1, 1]} : vector<9x128xf32> to vector<1x128xf32>
    %4 = vector.shape_cast %3 : vector<1x128xf32> to vector<128xf32>
    %5 = vector.shape_cast %4 : vector<128xf32> to vector<1x1x128xf32>
    %6 = vector.broadcast %5 : vector<1x1x128xf32> to vector<16x16x128xf32>
    %7 = arith.mulf %2, %6 : vector<16x16x128xf32>
    %c0_5 = arith.constant 0 : index
    %c0_6 = arith.constant 0 : index
    %c1 = arith.constant 1 : index
    %c0_7 = arith.constant 0 : index
    %8 = vector.load %arg1[%c0_5, %c0_6, %c1, %c0_7] : memref<1x18x18x128xf32, #tpu.memory_space<vmem>>, vector<1x16x16x128xf32>
    %9 = vector.shape_cast %8 : vector<1x16x16x128xf32> to vector<16x16x128xf32>
    %10 = vector.extract_strided_slice %0 {offsets = [1, 0], sizes = [1, 128], strides = [1, 1]} : vector<9x128xf32> to vector<1x128xf32>
    %11 = vector.shape_cast %10 : vector<1x128xf32> to vector<128xf32>
    %12 = vector.shape_cast %11 : vector<128xf32> to vector<1x1x128xf32>
    %13 = vector.broadcast %12 : vector<1x1x128xf32> to vector<16x16x128xf32>
    %14 = arith.mulf %9, %13 : vector<16x16x128xf32>
    %15 = arith.addf %7, %14 : vector<16x16x128xf32>
    %c0_8 = arith.constant 0 : index
    %c0_9 = arith.constant 0 : index
    %c2 = arith.constant 2 : index
    %c0_10 = arith.constant 0 : index
    %16 = vector.load %arg1[%c0_8, %c0_9, %c2, %c0_10] : memref<1x18x18x128xf32, #tpu.memory_space<vmem>>, vector<1x16x16x128xf32>
    %17 = vector.shape_cast %16 : vector<1x16x16x128xf32> to vector<16x16x128xf32>
    %18 = vector.extract_strided_slice %0 {offsets = [2, 0], sizes = [1, 128], strides = [1, 1]} : vector<9x128xf32> to vector<1x128xf32>
    %19 = vector.shape_cast %18 : vector<1x128xf32> to vector<128xf32>
    %20 = vector.shape_cast %19 : vector<128xf32> to vector<1x1x128xf32>
    %21 = vector.broadcast %20 : vector<1x1x128xf32> to vector<16x16x128xf32>
    %22 = arith.mulf %17, %21 : vector<16x16x128xf32>
    %23 = arith.addf %15, %22 : vector<16x16x128xf32>
    %c0_11 = arith.constant 0 : index
    %c1_12 = arith.constant 1 : index
    %c0_13 = arith.constant 0 : index
    %c0_14 = arith.constant 0 : index
    %24 = vector.load %arg1[%c0_11, %c1_12, %c0_13, %c0_14] : memref<1x18x18x128xf32, #tpu.memory_space<vmem>>, vector<1x16x16x128xf32>
    %25 = vector.shape_cast %24 : vector<1x16x16x128xf32> to vector<16x16x128xf32>
    %26 = vector.extract_strided_slice %0 {offsets = [3, 0], sizes = [1, 128], strides = [1, 1]} : vector<9x128xf32> to vector<1x128xf32>
    %27 = vector.shape_cast %26 : vector<1x128xf32> to vector<128xf32>
    %28 = vector.shape_cast %27 : vector<128xf32> to vector<1x1x128xf32>
    %29 = vector.broadcast %28 : vector<1x1x128xf32> to vector<16x16x128xf32>
    %30 = arith.mulf %25, %29 : vector<16x16x128xf32>
    %31 = arith.addf %23, %30 : vector<16x16x128xf32>
    %c0_15 = arith.constant 0 : index
    %c1_16 = arith.constant 1 : index
    %c1_17 = arith.constant 1 : index
    %c0_18 = arith.constant 0 : index
    %32 = vector.load %arg1[%c0_15, %c1_16, %c1_17, %c0_18] : memref<1x18x18x128xf32, #tpu.memory_space<vmem>>, vector<1x16x16x128xf32>
    %33 = vector.shape_cast %32 : vector<1x16x16x128xf32> to vector<16x16x128xf32>
    %34 = vector.extract_strided_slice %0 {offsets = [4, 0], sizes = [1, 128], strides = [1, 1]} : vector<9x128xf32> to vector<1x128xf32>
    %35 = vector.shape_cast %34 : vector<1x128xf32> to vector<128xf32>
    %36 = vector.shape_cast %35 : vector<128xf32> to vector<1x1x128xf32>
    %37 = vector.broadcast %36 : vector<1x1x128xf32> to vector<16x16x128xf32>
    %38 = arith.mulf %33, %37 : vector<16x16x128xf32>
    %39 = arith.addf %31, %38 : vector<16x16x128xf32>
    %c0_19 = arith.constant 0 : index
    %c1_20 = arith.constant 1 : index
    %c2_21 = arith.constant 2 : index
    %c0_22 = arith.constant 0 : index
    %40 = vector.load %arg1[%c0_19, %c1_20, %c2_21, %c0_22] : memref<1x18x18x128xf32, #tpu.memory_space<vmem>>, vector<1x16x16x128xf32>
    %41 = vector.shape_cast %40 : vector<1x16x16x128xf32> to vector<16x16x128xf32>
    %42 = vector.extract_strided_slice %0 {offsets = [5, 0], sizes = [1, 128], strides = [1, 1]} : vector<9x128xf32> to vector<1x128xf32>
    %43 = vector.shape_cast %42 : vector<1x128xf32> to vector<128xf32>
    %44 = vector.shape_cast %43 : vector<128xf32> to vector<1x1x128xf32>
    %45 = vector.broadcast %44 : vector<1x1x128xf32> to vector<16x16x128xf32>
    %46 = arith.mulf %41, %45 : vector<16x16x128xf32>
    %47 = arith.addf %39, %46 : vector<16x16x128xf32>
    %c0_23 = arith.constant 0 : index
    %c2_24 = arith.constant 2 : index
    %c0_25 = arith.constant 0 : index
    %c0_26 = arith.constant 0 : index
    %48 = vector.load %arg1[%c0_23, %c2_24, %c0_25, %c0_26] : memref<1x18x18x128xf32, #tpu.memory_space<vmem>>, vector<1x16x16x128xf32>
    %49 = vector.shape_cast %48 : vector<1x16x16x128xf32> to vector<16x16x128xf32>
    %50 = vector.extract_strided_slice %0 {offsets = [6, 0], sizes = [1, 128], strides = [1, 1]} : vector<9x128xf32> to vector<1x128xf32>
    %51 = vector.shape_cast %50 : vector<1x128xf32> to vector<128xf32>
    %52 = vector.shape_cast %51 : vector<128xf32> to vector<1x1x128xf32>
    %53 = vector.broadcast %52 : vector<1x1x128xf32> to vector<16x16x128xf32>
    %54 = arith.mulf %49, %53 : vector<16x16x128xf32>
    %55 = arith.addf %47, %54 : vector<16x16x128xf32>
    %c0_27 = arith.constant 0 : index
    %c2_28 = arith.constant 2 : index
    %c1_29 = arith.constant 1 : index
    %c0_30 = arith.constant 0 : index
    %56 = vector.load %arg1[%c0_27, %c2_28, %c1_29, %c0_30] : memref<1x18x18x128xf32, #tpu.memory_space<vmem>>, vector<1x16x16x128xf32>
    %57 = vector.shape_cast %56 : vector<1x16x16x128xf32> to vector<16x16x128xf32>
    %58 = vector.extract_strided_slice %0 {offsets = [7, 0], sizes = [1, 128], strides = [1, 1]} : vector<9x128xf32> to vector<1x128xf32>
    %59 = vector.shape_cast %58 : vector<1x128xf32> to vector<128xf32>
    %60 = vector.shape_cast %59 : vector<128xf32> to vector<1x1x128xf32>
    %61 = vector.broadcast %60 : vector<1x1x128xf32> to vector<16x16x128xf32>
    %62 = arith.mulf %57, %61 : vector<16x16x128xf32>
    %63 = arith.addf %55, %62 : vector<16x16x128xf32>
    %c0_31 = arith.constant 0 : index
    %c2_32 = arith.constant 2 : index
    %c2_33 = arith.constant 2 : index
    %c0_34 = arith.constant 0 : index
    %64 = vector.load %arg1[%c0_31, %c2_32, %c2_33, %c0_34] : memref<1x18x18x128xf32, #tpu.memory_space<vmem>>, vector<1x16x16x128xf32>
    %65 = vector.shape_cast %64 : vector<1x16x16x128xf32> to vector<16x16x128xf32>
    %66 = vector.extract_strided_slice %0 {offsets = [8, 0], sizes = [1, 128], strides = [1, 1]} : vector<9x128xf32> to vector<1x128xf32>
    %67 = vector.shape_cast %66 : vector<1x128xf32> to vector<128xf32>
    %68 = vector.shape_cast %67 : vector<128xf32> to vector<1x1x128xf32>
    %69 = vector.broadcast %68 : vector<1x1x128xf32> to vector<16x16x128xf32>
    %70 = arith.mulf %65, %69 : vector<16x16x128xf32>
    %71 = arith.addf %63, %70 : vector<16x16x128xf32>
    %c0_35 = arith.constant 0 : index
    %c0_36 = arith.constant 0 : index
    %72 = vector.load %arg3[%c0_35, %c0_36] : memref<1x128xf32, #tpu.memory_space<vmem>>, vector<1x128xf32>
    %73 = vector.shape_cast %72 : vector<1x128xf32> to vector<128xf32>
    %74 = vector.shape_cast %73 : vector<128xf32> to vector<1x1x128xf32>
    %75 = vector.broadcast %74 : vector<1x1x128xf32> to vector<16x16x128xf32>
    %76 = arith.mulf %71, %75 : vector<16x16x128xf32>
    %c0_37 = arith.constant 0 : index
    %c0_38 = arith.constant 0 : index
    %77 = vector.load %arg4[%c0_37, %c0_38] : memref<1x128xf32, #tpu.memory_space<vmem>>, vector<1x128xf32>
    %78 = vector.shape_cast %77 : vector<1x128xf32> to vector<128xf32>
    %79 = vector.shape_cast %78 : vector<128xf32> to vector<1x1x128xf32>
    %80 = vector.broadcast %79 : vector<1x1x128xf32> to vector<16x16x128xf32>
    %81 = arith.addf %76, %80 : vector<16x16x128xf32>
    %cst = arith.constant 0.000000e+00 : f32
    %82 = vector.broadcast %cst : f32 to vector<16x16x128xf32>
    %83 = arith.maximumf %81, %82 : vector<16x16x128xf32>
    %84 = vector.shape_cast %83 : vector<16x16x128xf32> to vector<256x128xf32>
    %85 = arith.truncf %84 : vector<256x128xf32> to vector<256x128xbf16>
    %c0_39 = arith.constant 0 : index
    %c0_40 = arith.constant 0 : index
    %86 = vector.load %arg5[%c0_39, %c0_40] : memref<128x128xbf16, #tpu.memory_space<vmem>>, vector<128x128xbf16>
    %cst_41 = arith.constant dense<0.000000e+00> : vector<256x128xf32>
    %87 = tpu.matmul %85, %86, %cst_41 {dimension_numbers = #tpu.dot_dimension_numbers<[1], [0], [0], [1], [0, 0, 1, 1], [], []>} : vector<256x128xbf16>, vector<128x128xbf16>, vector<256x128xf32> -> vector<256x128xf32>
    %c0_42 = arith.constant 0 : index
    %c0_43 = arith.constant 0 : index
    %c0_44 = arith.constant 0 : index
    %88 = vector.load %arg6[%c0_42, %c0_43, %c0_44] : memref<1x256x128xf32, #tpu.memory_space<vmem>>, vector<1x256x128xf32>
    %89 = vector.shape_cast %88 : vector<1x256x128xf32> to vector<256x128xf32>
    %90 = vector.shape_cast %87 : vector<256x128xf32> to vector<1x256x128xf32>
    tpu.vector_store %arg6[%c0_42, %c0_43, %c0_44], %90 {strides = array<i32>} : memref<1x256x128xf32, #tpu.memory_space<vmem>>, vector<1x256x128xf32>,
    return
  }
  func.func @transform_0(%arg0: i32) -> (i32, i32, i32, i32) {
    %c0_i32 = arith.constant 0 : i32
    %c0_i32_0 = arith.constant 0 : i32
    %c0_i32_1 = arith.constant 0 : i32
    %c0_i32_2 = arith.constant 0 : i32
    return %arg0, %c0_i32, %c0_i32_0, %c0_i32_1 : i32, i32, i32, i32
  }
  func.func @transform_1(%arg0: i32) -> (i32, i32) {
    %c0_i32 = arith.constant 0 : i32
    %c0_i32_0 = arith.constant 0 : i32
    %c0_i32_1 = arith.constant 0 : i32
    return %c0_i32, %c0_i32_0 : i32, i32
  }
  func.func @transform_2(%arg0: i32) -> (i32, i32) {
    %c0_i32 = arith.constant 0 : i32
    %c0_i32_0 = arith.constant 0 : i32
    %c0_i32_1 = arith.constant 0 : i32
    return %c0_i32, %c0_i32_0 : i32, i32
  }
  func.func @transform_3(%arg0: i32) -> (i32, i32) {
    %c0_i32 = arith.constant 0 : i32
    %c0_i32_0 = arith.constant 0 : i32
    %c0_i32_1 = arith.constant 0 : i32
    return %c0_i32, %c0_i32_0 : i32, i32
  }
  func.func @transform_4(%arg0: i32) -> (i32, i32) {
    %c0_i32 = arith.constant 0 : i32
    %c0_i32_0 = arith.constant 0 : i32
    %c0_i32_1 = arith.constant 0 : i32
    return %c0_i32, %c0_i32_0 : i32, i32
  }
  func.func @transform_5(%arg0: i32) -> (i32, i32, i32) {
    %c0_i32 = arith.constant 0 : i32
    %c0_i32_0 = arith.constant 0 : i32
    %c0_i32_1 = arith.constant 0 : i32
    return %arg0, %c0_i32, %c0_i32_0 : i32, i32, i32
  }
}

</mosaic_0001>

<bundles_post_ra>
// kernel: separable_conv2d2.1
= control target key start
LH: loop header
LB: loop body
LE: loop exit
PB: predicated region body
PF: predicated region fallthrough
CT: control target
= control target key end

     0   :  { %s1896_s18 = smov 0   ;;  %s2967_s0 = inlined_call_operand.vmem [shape: f32[2,18,18,128], index: 0, kind: input, shape index: {}]   ;;  %s2968_s1 = inlined_call_operand.vmem [shape: f32[9,128], index: 1, kind: input, shape index: {}]   ;;  %s2969_s2 = inlined_call_operand.vmem [shape: f32[1,128], index: 2, kind: input, shape index: {}]   ;;  %s2970_s3 = inlined_call_operand.vmem [shape: f32[1,128], index: 3, kind: input, shape index: {}]   ;;  %s2971_s4 = inlined_call_operand.vmem [shape: bf16[128,128], index: 4, kind: input, shape index: {}]   ;;  %s2972_s5 = inlined_call_operand.vmem [shape: f32[2,256,128], index: 5, kind: output, shape index: {}]  }
   0x1 LB: > { %s1536_s19 = sadd.s32 4294967295, %s1864_s18   ;;  %p1540_p0 = scmp.ge.s32.totalorder %s1864_s18, 1  ;;  %s1864_s18 = sphi %s1896_s18, %s15_s18  }
   0x2   : > { %p187_p1 = scmp.lt.s32.totalorder %s1864_s18, 3 }
   0x4   : > { %p188_p2 = pnand %p1540_p0, %p187_p1 }
   0x5   : > { %v1847_v0 = vld [vmem:[%s2971_s4] sm:$0xff] (!%p188_p2)   ;;  %p215_p3 = scmp.lt.s32.totalorder (!%p188_p2), %s1536_s19, 1  ;;  %v260_v1 = vlaneseq (!%p188_p2)  ;;  %v1848_v2 = vld [vmem:[%s2971_s4 + $0x8] sm:$0xff] (!%p188_p2)   ;;  %v1849_v4 = vld [vmem:[%s2971_s4 + $0x10] sm:$0xff] (!%p188_p2)  }
   0x6   : > { %191 = sbr.rel (%p188_p2) target bundleno = 413 (0x19d), region = 40  ;;  %1774 = vmatprep.subr.bf16.mxu0 (!%p188_p2), %v1847_v0  ;;  %1822 = vmatprep.subr.bf16.mxu1 (!%p188_p2), %v1847_v0  ;;  %v1850_v8 = vld [vmem:[%s2971_s4 + $0x18] sm:$0xff] (!%p188_p2)   ;;  %v226_v9 = vld [vmem:[%s2968_s1] sm:$0xff] (!%p188_p2)  ;;  %v1958_v26 = vld [vmem:[%s2968_s1 + $0x8] ss:$0 sm:$0xff] (!%p188_p2) }
   0x7   : > { %1775 = vmatpush3.bf16.msra.mxu0 (!%p188_p2), %v1847_v0  ;;  %1830 = vmatpush3.bf16.msra.mxu1 (!%p188_p2), %v1847_v0  ;;  %v1912_v3 = vshrl.u32 (!%p188_p2), %v260_v1, 7  ;;  %v1851_v25 = vld [vmem:[%s2971_s4 + $0x20] sm:$0xff] (!%p188_p2)   ;;  %v1852_v43 = vld [vmem:[%s2971_s4 + $0x28] sm:$0xff] (!%p188_p2)  }
   0x8   : > { %1776 = vmatprep.subr.bf16.mxu0 (!%p188_p2), %v1848_v2  ;;  %1823 = vmatprep.subr.bf16.mxu1 (!%p188_p2), %v1848_v2 }
   0x9   : > { %v262_v5 = vsub.s32 (!%p188_p2), 0, %v1912_v3  ;;  %v330_v6 = vsub.s32 (!%p188_p2), 1, %v1912_v3  ;;  %v430_v7 = vsub.s32 (!%p188_p2), 2, %v1912_v3  ;;  %v531_v11 = vsub.s32 (!%p188_p2), 3, %v1912_v3 }
   0xa   : > { %v631_v12 = vsub.s32 (!%p188_p2), 4, %v1912_v3  ;;  %v731_v23 = vsub.s32 (!%p188_p2), 5, %v1912_v3  ;;  %v832_v24 = vsub.s32 (!%p188_p2), 6, %v1912_v3  ;;  %v932_v30 = vsub.s32 (!%p188_p2), 7, %v1912_v3 }
   0xb   : > { %1777 = vmatpush3.bf16.msra.mxu0 (!%p188_p2), %v1848_v2  ;;  %1831 = vmatpush3.bf16.msra.mxu1 (!%p188_p2), %v1848_v2  ;;  %v1936_v14 = vrot.slane (!%p188_p2), %v226_v9, %v262_v5  ;;  %v1940_v17 = vrot.slane (!%p188_p2), %v226_v9, %v330_v6  ;;  %v1942_v18 = vrot.slane (!%p188_p2), %v226_v9, %v430_v7 }
   0xc   : > { %1778 = vmatprep.subr.bf16.mxu0 (!%p188_p2), %v1849_v4  ;;  %1824 = vmatprep.subr.bf16.mxu1 (!%p188_p2), %v1849_v4  ;;  %v1946_v21 = vrot.slane (!%p188_p2), %v226_v9, %v531_v11  ;;  %v1948_v22 = vrot.slane (!%p188_p2), %v226_v9, %v631_v12  ;;  %v1996_v47 = vrot.slane (!%p188_p2), %v226_v9, %v731_v23 }
   0xd   : > { %s2974_s19 = smov (!%p215_p3, %s1536_s19), 1  ;;  %v2001_v49 = vrot.slane %v226_v9, %v832_v24  ;;  %v2012_v54 = vrot.slane %v226_v9, %v932_v30 }
   0xe   : > { %s1838_s26 = smul.u32 432, %s2974_s19 }
   0xf   : > { %1779 = vmatpush3.bf16.msra.mxu0 %v1849_v4  ;;  %1832 = vmatpush3.bf16.msra.mxu1 %v1849_v4 }
  0x10   : > { %s1922_s29 = scalar_lea.vmem %s2967_s0, %s1838_s26  ;;  %1780 = vmatprep.subr.bf16.mxu0 %v1850_v8  ;;  %1825 = vmatprep.subr.bf16.mxu1 %v1850_v8 }
  0x11   : > { %v228_v10 = vld [vmem:[%s1922_s29] sm:$0xff]  ;;  %v229_v13 = vld [vmem:[%s1922_s29 + $0x8] sm:$0xff]  ;;  %v1968_v34 = vld [vmem:[%s1922_s29 + $0x18] sm:$0xff] }
  0x12   : > { %v296_v15 = vld [vmem:[%s1922_s29 + $0x1] sm:$0xff]  ;;  %v297_v16 = vld [vmem:[%s1922_s29 + $0x9] sm:$0xff]  ;;  %v264_v27 = vmul.f32 %v1936_v14, %v228_v10  ;;  %v265_v28 = vmul.f32 %v1936_v14, %v229_v13  ;;  %v1974_v36 = vld [vmem:[%s1922_s29 + $0x19] sm:$0xff]  ;;  %v533_v38 = vmul.f32 %v1968_v34, %v1946_v21 }
  0x13   : > { %v396_v19 = vld [vmem:[%s1922_s29 + $0x2] sm:$0xff]  ;;  %v397_v20 = vld [vmem:[%s1922_s29 + $0xa] sm:$0xff]  ;;  %v332_v29 = vmul.f32 %v1940_v17, %v296_v15  ;;  %v333_v31 = vmul.f32 %v1940_v17, %v297_v16  ;;  %v633_v41 = vmul.f32 %v1974_v36, %v1948_v22  ;;  %v1986_v42 = vld [vmem:[%s1922_s29 + $0x1a] sm:$0xff]  ;;  %1781 = vmatpush3.bf16.msra.mxu0 %v1850_v8  ;;  %1833 = vmatpush3.bf16.msra.mxu1 %v1850_v8 }
  0x14   : > { %v432_v32 = vmul.f32 %v1942_v18, %v396_v19  ;;  %v433_v33 = vmul.f32 %v1942_v18, %v397_v20  ;;  %v1971_v35 = vld [vmem:[%s1922_s29 + $0x20] sm:$0xff]  ;;  %v1999_v48 = vld [vmem:[%s1922_s29 + $0x30] sm:$0xff]  ;;  %v2007_v52 = vld [vmem:[%s1922_s29 + $0x38] sm:$0xff]  ;;  %1782 = vmatprep.subr.bf16.mxu0 %v1851_v25  ;;  %1826 = vmatprep.subr.bf16.mxu1 %v1851_v25  ;;  %v733_v58 = vmul.f32 %v1986_v42, %v1996_v47 }
  0x15   : > { %v364_v37 = vadd.f32 %v332_v29, %v264_v27  ;;  %v534_v39 = vmul.f32 %v1971_v35, %v1946_v21  ;;  %v1981_v40 = vld [vmem:[%s1922_s29 + $0x21] sm:$0xff]  ;;  %v365_v44 = vadd.f32 %v333_v31, %v265_v28  ;;  %v2004_v50 = vld [vmem:[%s1922_s29 + $0x32] sm:$0xff]  ;;  %v834_v0 = vmul.f32 %v1999_v48, %v2001_v49  ;;  %v313_v4 = vld [vmem:[%s1922_s29 + $0xc9] sm:$0xff] }
  0x16   : > { %v634_v45 = vmul.f32 %v1981_v40, %v1948_v22  ;;  %v1994_v46 = vld [vmem:[%s1922_s29 + $0x22] sm:$0xff]  ;;  %v2010_v53 = vld [vmem:[%s1922_s29 + $0x31] sm:$0xff]  ;;  %v2016_v55 = vmul.f32 %v1958_v26, %v2004_v50  ;;  %v2024_v60 = vld [vmem:[%s1922_s29 + $0x39] sm:$0xff]  ;;  %v835_v1 = vmul.f32 %v2007_v52, %v2001_v49  ;;  %v349_v19 = vmul.f32 %v1940_v17, %v313_v4 }
  0x17   : > { %v464_v51 = vadd.f32 %v432_v32, %v364_v37  ;;  %v244_v56 = vld [vmem:[%s1922_s29 + $0xc0] sm:$0xff]  ;;  %v465_v57 = vadd.f32 %v433_v33, %v365_v44  ;;  %v734_v59 = vmul.f32 %v1994_v46, %v1996_v47  ;;  %v245_v61 = vld [vmem:[%s1922_s29 + $0xc8] sm:$0xff]  ;;  %v934_v2 = vmul.f32 %v2010_v53, %v2012_v54  ;;  %1783 = vmatpush3.bf16.msra.mxu0 %v1851_v25  ;;  %v1853_v15 = vld [vmem:[%s2971_s4 + $0x30] sm:$0xff]  }
  0x18   : > { %v312_v62 = vld [vmem:[%s1922_s29 + $0xc1] sm:$0xff]  ;;  %v935_v7 = vmul.f32 %v2024_v60, %v2012_v54  ;;  %v280_v9 = vmul.f32 %v1936_v14, %v244_v56  ;;  %v413_v10 = vld [vmem:[%s1922_s29 + $0xca] sm:$0xff]  ;;  %1834 = vmatpush3.bf16.msra.mxu1 %v1851_v25  ;;  %v281_v12 = vmul.f32 %v1936_v14, %v245_v61  ;;  %1784 = vmatprep.subr.bf16.mxu0 %v1852_v43  ;;  %v2053_v23 = vld [vmem:[%s1922_s29 + $0xd8] sm:$0xff] }
  0x19   : > { %v565_v63 = vadd.f32 %v533_v38, %v464_v51  ;;  %v2035_v3 = vld [vmem:[%s1922_s29 + $0x3a] sm:$0xff]  ;;  %v412_v5 = vld [vmem:[%s1922_s29 + $0xc2] sm:$0xff]  ;;  %v566_v6 = vadd.f32 %v534_v39, %v465_v57  ;;  %v348_v13 = vmul.f32 %v1940_v17, %v312_v62  ;;  %1827 = vmatprep.subr.bf16.mxu1 %v1852_v43  ;;  %v449_v27 = vmul.f32 %v1942_v18, %v413_v10 }
  0x1a   : > { %v1035_v8 = vmul.f32 %v1958_v26, %v2035_v3  ;;  %v448_v20 = vmul.f32 %v1942_v18, %v412_v5  ;;  %v2057_v28 = vld [vmem:[%s1922_s29 + $0xe0] sm:$0xff]  ;;  %v549_v29 = vmul.f32 %v2053_v23, %v1946_v21  ;;  %v381_v32 = vadd.f32 %v349_v19, %v281_v12  ;;  %v1854_v51 = vld [vmem:[%s2971_s4 + $0x38] sm:$0xff]  }
  0x1b   : > { %v665_v11 = vadd.f32 %v633_v41, %v565_v63  ;;  %v666_v16 = vadd.f32 %v634_v45, %v566_v6  ;;  %v380_v25 = vadd.f32 %v348_v13, %v280_v9  ;;  %v2062_v30 = vld [vmem:[%s1922_s29 + $0xd9] sm:$0xff]  ;;  %v550_v33 = vmul.f32 %v2057_v28, %v1946_v21  ;;  %v2067_v37 = vld [vmem:[%s1922_s29 + $0xe1] sm:$0xff]  ;;  %1785 = vmatpush3.bf16.msra.mxu0 %v1852_v43 }
  0x1c   : > { %v649_v38 = vmul.f32 %v2062_v30, %v1948_v22  ;;  %1835 = vmatpush3.bf16.msra.mxu1 %v1852_v43  ;;  %v650_v44 = vmul.f32 %v2067_v37, %v1948_v22  ;;  %v2074_v45 = vld [vmem:[%s1922_s29 + $0xda] sm:$0xff]  ;;  %1786 = vmatprep.subr.bf16.mxu0 %v1853_v15  ;;  %v481_v57 = vadd.f32 %v449_v27, %v381_v32 }
  0x1d   : > { %v765_v24 = vadd.f32 %v733_v58, %v665_v11  ;;  %v766_v31 = vadd.f32 %v734_v59, %v666_v16  ;;  %v480_v41 = vadd.f32 %v448_v20, %v380_v25  ;;  %1828 = vmatprep.subr.bf16.mxu1 %v1853_v15  ;;  %v2080_v58 = vld [vmem:[%s1922_s29 + $0xe2] sm:$0xff]  ;;  %v749_v43 = vmul.f32 %v2074_v45, %v1996_v47  ;;  %v2085_v59 = vld [vmem:[%s1922_s29 + $0xf0] sm:$0xff]  ;;  %v2100_v6 = vld [vmem:[%s2969_s2] ss:$0 sm:$0xff] }
  0x1e   : > { %v750_v63 = vmul.f32 %v2080_v58, %v1996_v47  ;;  %v850_v4 = vmul.f32 %v2085_v59, %v2001_v49  ;;  %v2105_v10 = vld [vmem:[%s1922_s29 + $0xf9] sm:$0xff] }
  0x1f   : > { %v866_v39 = vadd.f32 %v834_v0, %v765_v24  ;;  %v867_v56 = vadd.f32 %v835_v1, %v766_v31  ;;  %v581_v62 = vadd.f32 %v549_v29, %v480_v41  ;;  %v2090_v0 = vld [vmem:[%s1922_s29 + $0xf8] sm:$0xff]  ;;  %1787 = vmatpush3.bf16.msra.mxu0 %v1853_v15  ;;  %v951_v13 = vmul.f32 %v2105_v10, %v2012_v54  ;;  %v2118_v20 = vld [vmem:[%s2970_s3] ss:$0 sm:$0xff] }
  0x20   : > { %v2095_v1 = vld [vmem:[%s1922_s29 + $0xf1] sm:$0xff]  ;;  %v851_v9 = vmul.f32 %v2090_v0, %v2001_v49  ;;  %1836 = vmatpush3.bf16.msra.mxu1 %v1853_v15  ;;  %1788 = vmatprep.subr.bf16.mxu0 %v1854_v51  ;;  %v2121_v25 = vld [vmem:[%s1922_s29 + $0xfa] sm:$0xff] }
  0x21   : > { %v966_v61 = vadd.f32 %v934_v2, %v866_v39  ;;  %v967_v5 = vadd.f32 %v935_v7, %v867_v56  ;;  %v582_v2 = vadd.f32 %v550_v33, %v481_v57  ;;  %v950_v11 = vmul.f32 %v2095_v1, %v2012_v54  ;;  %v2113_v16 = vld [vmem:[%s1922_s29 + $0xf2] sm:$0xff]  ;;  %1829 = vmatprep.subr.bf16.mxu1 %v1854_v51 }
  0x22   : > { %v681_v7 = vadd.f32 %v649_v38, %v581_v62  ;;  %v1051_v29 = vmul.f32 %v1958_v26, %v2121_v25  ;;  %v267_v33 = vmul.f32 %v1971_v35, %v1936_v14  ;;  %v334_v38 = vmul.f32 %v1974_v36, %v1940_v17 }
  0x23   : > { %v1066_v12 = vadd.f32 %v2016_v55, %v966_v61  ;;  %v1067_v19 = vadd.f32 %v1035_v8, %v967_v5  ;;  %v682_v24 = vadd.f32 %v650_v44, %v582_v2  ;;  %v1050_v55 = vmul.f32 %v1958_v26, %v2113_v16  ;;  %1789 = vmatpush3.bf16.msra.mxu0 %v1854_v51 }
  0x24   : > { %v781_v27 = vadd.f32 %v749_v43, %v681_v7  ;;  %v266_v8 = vmul.f32 %v1968_v34, %v1936_v14  ;;  %1837 = vmatpush3.bf16.msra.mxu1 %v1854_v51  ;;  %v335_v44 = vmul.f32 %v1981_v40, %v1940_v17  ;;  %v434_v43 = vmul.f32 %v1986_v42, %v1942_v18 }
  0x25   : > { %v1105_v15 = vmul.f32 %v2100_v6, %v1066_v12  ;;  %v1106_v31 = vmul.f32 %v2100_v6, %v1067_v19  ;;  %v782_v32 = vadd.f32 %v750_v63, %v682_v24  ;;  %v435_v36 = vmul.f32 %v1994_v46, %v1942_v18 }
  0x26   : > { %v882_v41 = vadd.f32 %v850_v4, %v781_v27  ;;  %v366_v57 = vadd.f32 %v334_v38, %v266_v8  ;;  %v367_v62 = vadd.f32 %v335_v44, %v267_v33  ;;  %v535_v40 = vmul.f32 %v1999_v48, %v1946_v21  ;;  %v2160_v27 = vld [vmem:[%s1922_s29 + $0x50] sm:$0xff] }
  0x27   : > { %v1144_v39 = vadd.f32 %v2118_v20, %v1105_v15  ;;  %v1145_v56 = vadd.f32 %v2118_v20, %v1106_v31  ;;  %v883_v34 = vadd.f32 %v851_v9, %v782_v32  ;;  %v536_v9 = vmul.f32 %v2007_v52, %v1946_v21  ;;  %v2157_v15 = vld [vmem:[%s1922_s29 + $0x48] sm:$0xff]  ;;  %v2171_v38 = vld [vmem:[%s1922_s29 + $0x51] sm:$0xff] }
  0x28   : > { %v982_v35 = vadd.f32 %v950_v11, %v882_v41  ;;  %v466_v4 = vadd.f32 %v434_v43, %v366_v57  ;;  %v467_v2 = vadd.f32 %v435_v36, %v367_v62  ;;  %v635_v42 = vmul.f32 %v2010_v53, %v1948_v22  ;;  %v2168_v33 = vld [vmem:[%s1922_s29 + $0x49] sm:$0xff]  ;;  %v2182_v57 = vld [vmem:[%s1922_s29 + $0x52] sm:$0xff] }
  0x29   : > { %v1176_v61 = vmax.f32 %v1144_v39, 0.0  ;;  %v1177_v51 = vmax.f32 %v1145_v56, 0.0  ;;  %v983_v63 = vadd.f32 %v951_v13, %v883_v34  ;;  %v636_v7 = vmul.f32 %v2024_v60, %v1948_v22  ;;  %v2179_v34 = vld [vmem:[%s1922_s29 + $0x4a] sm:$0xff] }
  0x2a   : > { %v1082_v5 = vadd.f32 %v1050_v55, %v982_v35  ;;  %v567_v12 = vadd.f32 %v535_v40, %v466_v4  ;;  %v568_v19 = vadd.f32 %v536_v9, %v467_v2  ;;  %v735_v24 = vmul.f32 %v2004_v50, %v1996_v47 }
  0x2b   : > { %v1208_v11 = vpack.c.bf16 %v1177_v51, %v1176_v61  ;;  %v1083_v46 = vadd.f32 %v1051_v29, %v983_v63  ;;  %v736_v55 = vmul.f32 %v2035_v3, %v1996_v47  ;;  %v836_v31 = vmul.f32 %v2157_v15, %v2001_v49 }
  0x2c   : > { %v1121_v13 = vmul.f32 %v2100_v6, %v1082_v5  ;;  %v667_v8 = vadd.f32 %v635_v42, %v567_v12  ;;  %v837_v32 = vmul.f32 %v2160_v27, %v2001_v49  ;;  %v668_v41 = vadd.f32 %v636_v7, %v568_v19 }
  0x2d   : > { %1790 = vmatprep.mubr.bf16.mxu0 %v1208_v11  ;;  %v1122_v29 = vmul.f32 %v2100_v6, %v1083_v46  ;;  %v936_v44 = vmul.f32 %v2168_v33, %v2012_v54  ;;  %v937_v56 = vmul.f32 %v2171_v38, %v2012_v54  ;;  %v1036_v35 = vmul.f32 %v1958_v26, %v2179_v34 }
  0x2e   : > { %v1160_v39 = vadd.f32 %v2118_v20, %v1121_v13  ;;  %v767_v61 = vadd.f32 %v735_v24, %v667_v8  ;;  %v1037_v62 = vmul.f32 %v1958_v26, %v2182_v57  ;;  %v768_v51 = vadd.f32 %v736_v55, %v668_v41  ;;  %v2212_v8 = vld [vmem:[%s1922_s29 + $0x108] sm:$0xff] }
  0x2f   : > { %v1161_v43 = vadd.f32 %v2118_v20, %v1122_v29  ;;  %v282_v63 = vmul.f32 %v2053_v23, %v1936_v14  ;;  %v283_v4 = vmul.f32 %v2057_v28, %v1936_v14  ;;  %v350_v2 = vmul.f32 %v2062_v30, %v1940_v17 }
  0x30   : > { %v1192_v36 = vmax.f32 %v1160_v39, 0.0  ;;  %v868_v5 = vadd.f32 %v836_v31, %v767_v61  ;;  %v351_v9 = vmul.f32 %v2067_v37, %v1940_v17  ;;  %v869_v42 = vadd.f32 %v837_v32, %v768_v51  ;;  %v2215_v31 = vld [vmem:[%s1922_s29 + $0x110] sm:$0xff] }
  0x31   : > { %v1193_v40 = vmax.f32 %v1161_v43, 0.0  ;;  %v450_v11 = vmul.f32 %v2074_v45, %v1942_v18  ;;  %v451_v46 = vmul.f32 %v2080_v58, %v1942_v18  ;;  %v551_v23 = vmul.f32 %v2085_v59, %v1946_v21  ;;  %v2233_v51 = vld [vmem:[%s1922_s29 + $0x10a] sm:$0xff] }
  0x32   : > { %v968_v12 = vadd.f32 %v936_v44, %v868_v5  ;;  %v382_v7 = vadd.f32 %v350_v2, %v282_v63  ;;  %v383_v13 = vadd.f32 %v351_v9, %v283_v4  ;;  %v969_v30 = vadd.f32 %v937_v56, %v869_v42  ;;  %v2224_v56 = vld [vmem:[%s1922_s29 + $0x109] sm:$0xff]  ;;  %v2236_v63 = vld [vmem:[%s1922_s29 + $0x112] sm:$0xff] }
  0x33   : > { %v1216_v28 = vpack.c.bf16 %v1193_v40, %v1192_v36  ;;  %v552_v37 = vmul.f32 %v2090_v0, %v1946_v21  ;;  %v651_v45 = vmul.f32 %v2095_v1, %v1948_v22  ;;  %v652_v19 = vmul.f32 %v2105_v10, %v1948_v22  ;;  %v2228_v36 = vld [vmem:[%s1922_s29 + $0x111] sm:$0xff] }
  0x34   : > { %v1068_v58 = vadd.f32 %v1036_v35, %v968_v12  ;;  %v482_v24 = vadd.f32 %v450_v11, %v382_v7  ;;  %v483_v55 = vadd.f32 %v451_v46, %v383_v13  ;;  %v751_v29 = vmul.f32 %v2113_v16, %v1996_v47 }
  0x35   : > { %1806 = vmatprep.mubr.bf16.mxu1 %v1216_v28  ;;  %v1069_v32 = vadd.f32 %v1037_v62, %v969_v30  ;;  %v752_v39 = vmul.f32 %v2121_v25, %v1996_v47  ;;  %v852_v41 = vmul.f32 %v2212_v8, %v2001_v49  ;;  %v853_v44 = vmul.f32 %v2215_v31, %v2001_v49 }
  0x36   : > { %v1107_v43 = vmul.f32 %v2100_v6, %v1068_v58  ;;  %v583_v61 = vadd.f32 %v551_v23, %v482_v24  ;;  %v584_v35 = vadd.f32 %v552_v37, %v483_v55  ;;  %v952_v62 = vmul.f32 %v2224_v56, %v2012_v54 }
  0x37   : > { %v1108_v4 = vmul.f32 %v2100_v6, %v1069_v32  ;;  %v953_v40 = vmul.f32 %v2228_v36, %v2012_v54  ;;  %v1052_v5 = vmul.f32 %v1958_v26, %v2233_v51  ;;  %v1053_v2 = vmul.f32 %v1958_v26, %v2236_v63 }
  0x38   : > { %v1146_v9 = vadd.f32 %v2118_v20, %v1107_v43  ;;  %v683_v42 = vadd.f32 %v651_v45, %v583_v61  ;;  %v684_v11 = vadd.f32 %v652_v19, %v584_v35  ;;  %v268_v46 = vmul.f32 %v1999_v48, %v1936_v14 }
  0x39   : > { %v1147_v23 = vadd.f32 %v2118_v20, %v1108_v4  ;;  %v269_v28 = vmul.f32 %v2007_v52, %v1936_v14  ;;  %v336_v12 = vmul.f32 %v2010_v53, %v1940_v17  ;;  %v337_v7 = vmul.f32 %v2024_v60, %v1940_v17 }
  0x3a   : > { %v1178_v13 = vmax.f32 %v1146_v9, 0.0  ;;  %v783_v30 = vadd.f32 %v751_v29, %v683_v42  ;;  %v784_v37 = vadd.f32 %v752_v39, %v684_v11  ;;  %v436_v45 = vmul.f32 %v2004_v50, %v1942_v18  ;;  %v2275_v42 = vld [vmem:[%s1922_s29 + $0x68] sm:$0xff] }
  0x3b   : > { %v1179_v19 = vmax.f32 %v1147_v23, 0.0  ;;  %v368_v48 = vadd.f32 %v336_v12, %v268_v46  ;;  %v369_v58 = vadd.f32 %v337_v7, %v269_v28  ;;  %v437_v24 = vmul.f32 %v2035_v3, %v1942_v18  ;;  %v2285_v28 = vld [vmem:[%s1922_s29 + $0x69] sm:$0xff] }
  0x3c   : > { %v884_v52 = vadd.f32 %v852_v41, %v783_v30  ;;  %v885_v55 = vadd.f32 %v853_v44, %v784_v37  ;;  %v537_v53 = vmul.f32 %v2157_v15, %v1946_v21  ;;  %v538_v60 = vmul.f32 %v2160_v27, %v1946_v21  ;;  %v2270_v44 = vld [vmem:[%s1922_s29 + $0x60] sm:$0xff] }
  0x3d   : > { %v1209_v29 = vpack.c.bf16 %v1179_v19, %v1178_v13  ;;  %v468_v32 = vadd.f32 %v436_v45, %v368_v48  ;;  %v469_v50 = vadd.f32 %v437_v24, %v369_v58  ;;  %v637_v39 = vmul.f32 %v2168_v33, %v1948_v22  ;;  %v2290_v7 = vld [vmem:[%s1922_s29 + $0x62] sm:$0xff]  ;;  %v2295_v45 = vld [vmem:[%s1922_s29 + $0x6a] sm:$0xff] }
  0x3e   : > { %v984_v43 = vadd.f32 %v952_v62, %v884_v52  ;;  %v985_v61 = vadd.f32 %v953_v40, %v885_v55  ;;  %v638_v3 = vmul.f32 %v2171_v38, %v1948_v22  ;;  %v737_v41 = vmul.f32 %v2179_v34, %v1996_v47  ;;  %v2280_v40 = vld [vmem:[%s1922_s29 + $0x61] sm:$0xff] }
  0x3f   : > { %1791 = vmatmul.mubr.bf16.vlgmr.msra.gmra.mrb[0].mxu0 %v1209_v29  ;;  %v569_v35 = vadd.f32 %v537_v53, %v468_v32  ;;  %v570_v4 = vadd.f32 %v538_v60, %v469_v50  ;;  %v738_v9 = vmul.f32 %v2182_v57, %v1996_v47  ;;  %v838_v62 = vmul.f32 %v2270_v44, %v2001_v49 }
  0x40   : > { %v1084_v11 = vadd.f32 %v1052_v5, %v984_v43  ;;  %v1085_v46 = vadd.f32 %v1053_v2, %v985_v61  ;;  %v839_v23 = vmul.f32 %v2275_v42, %v2001_v49  ;;  %v938_v12 = vmul.f32 %v2280_v40, %v2012_v54 }
  0x41   : > { %v669_v13 = vadd.f32 %v637_v39, %v569_v35  ;;  %v670_v30 = vadd.f32 %v638_v3, %v570_v4  ;;  %v939_v37 = vmul.f32 %v2285_v28, %v2012_v54  ;;  %v1038_v5 = vmul.f32 %v1958_v26, %v2290_v7 }
  0x42   : > { %v1123_v2 = vmul.f32 %v2100_v6, %v1084_v11  ;;  %v1124_v19 = vmul.f32 %v2100_v6, %v1085_v46  ;;  %v1039_v48 = vmul.f32 %v1958_v26, %v2295_v45  ;;  %v284_v58 = vmul.f32 %v2085_v59, %v1936_v14 }
  0x43   : > { %v769_v24 = vadd.f32 %v737_v41, %v669_v13  ;;  %v770_v52 = vadd.f32 %v738_v9, %v670_v30  ;;  %v285_v55 = vmul.f32 %v2090_v0, %v1936_v14  ;;  %v352_v53 = vmul.f32 %v2095_v1, %v1940_v17  ;;  %v2328_v30 = vld [vmem:[%s1922_s29 + $0x120] sm:$0xff] }
  0x44   : > { %v1162_v60 = vadd.f32 %v2118_v20, %v1123_v2  ;;  %v1163_v29 = vadd.f32 %v2118_v20, %v1124_v19  ;;  %v353_v32 = vmul.f32 %v2105_v10, %v1940_v17  ;;  %v452_v50 = vmul.f32 %v2113_v16, %v1942_v18 }
  0x45   : > { %v870_v39 = vadd.f32 %v838_v62, %v769_v24  ;;  %v871_v59 = vadd.f32 %v839_v23, %v770_v52  ;;  %v384_v43 = vadd.f32 %v352_v53, %v284_v58  ;;  %v453_v61 = vmul.f32 %v2121_v25, %v1942_v18  ;;  %v2345_v53 = vld [vmem:[%s1922_s29 + $0x129] sm:$0xff] }
  0x46   : > { %v1194_v0 = vmax.f32 %v1162_v60, 0.0  ;;  %v1195_v3 = vmax.f32 %v1163_v29, 0.0  ;;  %v385_v1 = vadd.f32 %v353_v32, %v285_v55  ;;  %v553_v41 = vmul.f32 %v2212_v8, %v1946_v21  ;;  %v2350_v29 = vld [vmem:[%s1922_s29 + $0x122] sm:$0xff]  ;;  %v2353_v32 = vld [vmem:[%s1922_s29 + $0x12a] sm:$0xff] }
  0x47   : > { %v970_v35 = vadd.f32 %v938_v12, %v870_v39  ;;  %v971_v4 = vadd.f32 %v939_v37, %v871_v59  ;;  %v484_v10 = vadd.f32 %v452_v50, %v384_v43  ;;  %v554_v16 = vmul.f32 %v2215_v31, %v1946_v21  ;;  %v2331_v37 = vld [vmem:[%s1922_s29 + $0x128] sm:$0xff] }
  0x48   : > { %v1217_v9 = vpack.c.bf16 %v1195_v3, %v1194_v0  ;;  %v485_v62 = vadd.f32 %v453_v61, %v385_v1  ;;  %v653_v25 = vmul.f32 %v2224_v56, %v1948_v22  ;;  %v654_v11 = vmul.f32 %v2228_v36, %v1948_v22 }
  0x49   : > { %v1070_v46 = vadd.f32 %v1038_v5, %v970_v35  ;;  %v1071_v23 = vadd.f32 %v1039_v48, %v971_v4  ;;  %v585_v13 = vadd.f32 %v553_v41, %v484_v10  ;;  %v753_v12 = vmul.f32 %v2233_v51, %v1996_v47  ;;  %v2340_v48 = vld [vmem:[%s1922_s29 + $0x121] sm:$0xff] }
  0x4a   : > { %1807 = vmatmul.mubr.bf16.vlgmr.msra.gmra.mrb[0].mxu1 %v1217_v9  ;;  %v586_v2 = vadd.f32 %v554_v16, %v485_v62  ;;  %v754_v19 = vmul.f32 %v2236_v63, %v1996_v47  ;;  %v854_v58 = vmul.f32 %v2328_v30, %v2001_v49  ;;  %v855_v5 = vmul.f32 %v2331_v37, %v2001_v49 }
  0x4b   : > { %v1109_v24 = vmul.f32 %v2100_v6, %v1070_v46  ;;  %v1110_v52 = vmul.f32 %v2100_v6, %v1071_v23  ;;  %v685_v55 = vadd.f32 %v653_v25, %v585_v13  ;;  %v954_v60 = vmul.f32 %v2340_v48, %v2012_v54 }
  0x4c   : > { %v686_v50 = vadd.f32 %v654_v11, %v586_v2  ;;  %v955_v39 = vmul.f32 %v2345_v53, %v2012_v54  ;;  %v1054_v59 = vmul.f32 %v1958_v26, %v2350_v29  ;;  %v1055_v43 = vmul.f32 %v1958_v26, %v2353_v32 }
  0x4d   : > { %v1148_v61 = vadd.f32 %v2118_v20, %v1109_v24  ;;  %v1149_v0 = vadd.f32 %v2118_v20, %v1110_v52  ;;  %v785_v3 = vadd.f32 %v753_v12, %v685_v55  ;;  %v270_v1 = vmul.f32 %v2157_v15, %v1936_v14  ;;  %v2388_v52 = vld [vmem:[%s1922_s29 + $0x78] sm:$0xff] }
  0x4e   : > { %v786_v41 = vadd.f32 %v754_v19, %v686_v50  ;;  %v271_v35 = vmul.f32 %v2160_v27, %v1936_v14  ;;  %v338_v4 = vmul.f32 %v2168_v33, %v1940_v17  ;;  %v339_v10 = vmul.f32 %v2171_v38, %v1940_v17 }
  0x4f   : > { %v1180_v16 = vmax.f32 %v1148_v61, 0.0  ;;  %v1181_v9 = vmax.f32 %v1149_v0, 0.0  ;;  %v886_v62 = vadd.f32 %v854_v58, %v785_v3  ;;  %v438_v25 = vmul.f32 %v2179_v34, %v1942_v18  ;;  %v2396_v61 = vld [vmem:[%s1922_s29 + $0x79] sm:$0xff]  ;;  %v2399_v0 = vld [vmem:[%s1922_s29 + $0x81] sm:$0xff] }
  0x50   : > { %v887_v11 = vadd.f32 %v855_v5, %v786_v41  ;;  %v370_v46 = vadd.f32 %v338_v4, %v270_v1  ;;  %v371_v15 = vadd.f32 %v339_v10, %v271_v35  ;;  %v439_v23 = vmul.f32 %v2182_v57, %v1942_v18  ;;  %v2409_v35 = vld [vmem:[%s1922_s29 + $0x7a] sm:$0xff] }
  0x51   : > { %v1210_v27 = vpack.c.bf16 %v1181_v9, %v1180_v16  ;;  %v986_v13 = vadd.f32 %v954_v60, %v886_v62  ;;  %v539_v33 = vmul.f32 %v2270_v44, %v1946_v21  ;;  %v540_v38 = vmul.f32 %v2275_v42, %v1946_v21  ;;  %v2413_v9 = vld [vmem:[%s1922_s29 + $0x82] sm:$0xff] }
  0x52   : > { %v987_v12 = vadd.f32 %v955_v39, %v887_v11  ;;  %v470_v34 = vadd.f32 %v438_v25, %v370_v46  ;;  %v471_v2 = vadd.f32 %v439_v23, %v371_v15  ;;  %v639_v19 = vmul.f32 %v2280_v40, %v1948_v22  ;;  %v2391_v39 = vld [vmem:[%s1922_s29 + $0x80] sm:$0xff] }
  0x53   : > { %1794 = vmatprep.mubr.bf16.mxu0 %v1210_v27  ;;  %v1086_v58 = vadd.f32 %v1054_v59, %v986_v13  ;;  %v640_v57 = vmul.f32 %v2285_v28, %v1948_v22  ;;  %v739_v5 = vmul.f32 %v2290_v7, %v1996_v47  ;;  %v740_v24 = vmul.f32 %v2295_v45, %v1996_v47 }
  0x54   : > { %v1087_v55 = vadd.f32 %v1055_v43, %v987_v12  ;;  %v571_v60 = vadd.f32 %v539_v33, %v470_v34  ;;  %v572_v50 = vadd.f32 %v540_v38, %v471_v2  ;;  %v840_v59 = vmul.f32 %v2388_v52, %v2001_v49 }
  0x55   : > { %v1125_v3 = vmul.f32 %v2100_v6, %v1086_v58  ;;  %v841_v1 = vmul.f32 %v2391_v39, %v2001_v49  ;;  %v940_v41 = vmul.f32 %v2396_v61, %v2012_v54  ;;  %v941_v43 = vmul.f32 %v2399_v0, %v2012_v54 }
  0x56   : > { %v1126_v4 = vmul.f32 %v2100_v6, %v1087_v55  ;;  %v671_v10 = vadd.f32 %v639_v19, %v571_v60  ;;  %v672_v16 = vadd.f32 %v640_v57, %v572_v50  ;;  %v1040_v62 = vmul.f32 %v1958_v26, %v2409_v35 }
  0x57   : > { %v1164_v25 = vadd.f32 %v2118_v20, %v1125_v3  ;;  %v1041_v11 = vmul.f32 %v1958_v26, %v2413_v9  ;;  %v286_v46 = vmul.f32 %v2212_v8, %v1936_v14  ;;  %v287_v15 = vmul.f32 %v2215_v31, %v1936_v14 }
  0x58   : > { %v1165_v23 = vadd.f32 %v2118_v20, %v1126_v4  ;;  %v771_v27 = vadd.f32 %v739_v5, %v671_v10  ;;  %v772_v13 = vadd.f32 %v740_v24, %v672_v16  ;;  %v354_v33 = vmul.f32 %v2224_v56, %v1940_v17 }
  0x59   : > { %v1196_v38 = vmax.f32 %v1164_v25, 0.0  ;;  %v355_v12 = vmul.f32 %v2228_v36, %v1940_v17  ;;  %v454_v34 = vmul.f32 %v2233_v51, %v1942_v18  ;;  %v455_v8 = vmul.f32 %v2236_v63, %v1942_v18  ;;  %v2454_v25 = vld [vmem:[%s1922_s29 + $0x139] sm:$0xff] }
  0x5a   : > { %v1197_v2 = vmax.f32 %v1165_v23, 0.0  ;;  %v872_v31 = vadd.f32 %v840_v59, %v771_v27  ;;  %v873_v19 = vadd.f32 %v841_v1, %v772_v13  ;;  %v386_v58 = vadd.f32 %v354_v33, %v286_v46  ;;  %v2446_v1 = vld [vmem:[%s1922_s29 + $0x138] sm:$0xff]  ;;  %v2457_v46 = vld [vmem:[%s1922_s29 + $0x141] sm:$0xff] }
  0x5b   : > { %v387_v57 = vadd.f32 %v355_v12, %v287_v15  ;;  %v555_v5 = vmul.f32 %v2328_v30, %v1946_v21  ;;  %v556_v56 = vmul.f32 %v2331_v37, %v1946_v21  ;;  %v655_v36 = vmul.f32 %v2340_v48, %v1948_v22  ;;  %v2471_v12 = vld [vmem:[%s1922_s29 + $0x142] sm:$0xff] }
  0x5c   : > { %v1218_v51 = vpack.c.bf16 %v1197_v2, %v1196_v38  ;;  %v972_v63 = vadd.f32 %v940_v41, %v872_v31  ;;  %v973_v24 = vadd.f32 %v941_v43, %v873_v19  ;;  %v486_v55 = vadd.f32 %v454_v34, %v386_v58  ;;  %v2449_v43 = vld [vmem:[%s1922_s29 + $0x140] sm:$0xff] }
  0x5d   : > { %v487_v60 = vadd.f32 %v455_v8, %v387_v57  ;;  %v656_v50 = vmul.f32 %v2345_v53, %v1948_v22  ;;  %v755_v59 = vmul.f32 %v2350_v29, %v1996_v47  ;;  %v756_v3 = vmul.f32 %v2353_v32, %v1996_v47 }
  0x5e   : > { %1810 = vmatprep.mubr.bf16.mxu1 %v1218_v51  ;;  %v1072_v4 = vadd.f32 %v1040_v62, %v972_v63  ;;  %v1073_v10 = vadd.f32 %v1041_v11, %v973_v24  ;;  %v587_v41 = vadd.f32 %v555_v5, %v486_v55  ;;  %v856_v16 = vmul.f32 %v2446_v1, %v2001_v49  ;;  %v2466_v11 = vld [vmem:[%s1922_s29 + $0x13a] sm:$0xff] }
  0x5f   : > { %v588_v15 = vadd.f32 %v556_v56, %v487_v60  ;;  %v857_v23 = vmul.f32 %v2449_v43, %v2001_v49  ;;  %v956_v27 = vmul.f32 %v2454_v25, %v2012_v54  ;;  %v957_v62 = vmul.f32 %v2457_v46, %v2012_v54 }
  0x60   : > { %v1111_v13 = vmul.f32 %v2100_v6, %v1072_v4  ;;  %v1112_v33 = vmul.f32 %v2100_v6, %v1073_v10  ;;  %v687_v38 = vadd.f32 %v655_v36, %v587_v41  ;;  %v1056_v34 = vmul.f32 %v1958_v26, %v2466_v11 }
  0x61   : > { %v688_v8 = vadd.f32 %v656_v50, %v588_v15  ;;  %v1057_v2 = vmul.f32 %v1958_v26, %v2471_v12  ;;  %v272_v31 = vmul.f32 %v2270_v44, %v1936_v14  ;;  %v273_v19 = vmul.f32 %v2275_v42, %v1936_v14 }
  0x62   : > { %v1150_v58 = vadd.f32 %v2118_v20, %v1111_v13  ;;  %v1151_v57 = vadd.f32 %v2118_v20, %v1112_v33  ;;  %v787_v5 = vadd.f32 %v755_v59, %v687_v38  ;;  %v340_v56 = vmul.f32 %v2280_v40, %v1940_v17  ;;  %v2507_v38 = vld [vmem:[%s1922_s29 + $0x98] sm:$0xff] }
  0x63   : > { %v788_v36 = vadd.f32 %v756_v3, %v688_v8  ;;  %v341_v51 = vmul.f32 %v2285_v28, %v1940_v17  ;;  %v440_v63 = vmul.f32 %v2290_v7, %v1942_v18  ;;  %v441_v44 = vmul.f32 %v2295_v45, %v1942_v18  ;;  %v2512_v8 = vld [vmem:[%s1922_s29 + $0x91] sm:$0xff] }
  0x64   : > { %v1182_v24 = vmax.f32 %v1150_v58, 0.0  ;;  %v1183_v42 = vmax.f32 %v1151_v57, 0.0  ;;  %v888_v55 = vadd.f32 %v856_v16, %v787_v5  ;;  %v372_v60 = vadd.f32 %v340_v56, %v272_v31  ;;  %v2517_v57 = vld [vmem:[%s1922_s29 + $0x99] sm:$0xff] }
  0x65   : > { %v889_v50 = vadd.f32 %v857_v23, %v788_v36  ;;  %v373_v59 = vadd.f32 %v341_v51, %v273_v19  ;;  %v541_v40 = vmul.f32 %v2388_v52, %v1946_v21  ;;  %v542_v28 = vmul.f32 %v2391_v39, %v1946_v21  ;;  %v2502_v23 = vld [vmem:[%s1922_s29 + $0x90] sm:$0xff] }
  0x66   : > { %v1211_v3 = vpack.c.bf16 %v1183_v42, %v1182_v24  ;;  %v988_v7 = vadd.f32 %v956_v27, %v888_v55  ;;  %v472_v4 = vadd.f32 %v440_v63, %v372_v60  ;;  %v641_v45 = vmul.f32 %v2396_v61, %v1948_v22  ;;  %v2522_v5 = vld [vmem:[%s1922_s29 + $0x92] sm:$0xff]  ;;  %v2528_v63 = vld [vmem:[%s1922_s29 + $0x9a] sm:$0xff] }
  0x67   : > { %v989_v10 = vadd.f32 %v957_v62, %v889_v50  ;;  %v473_v41 = vadd.f32 %v441_v44, %v373_v59  ;;  %v642_v16 = vmul.f32 %v2399_v0, %v1948_v22  ;;  %v741_v15 = vmul.f32 %v2409_v35, %v1996_v47 }
  0x68   : > { %1795 = vmatmul.mubr.bf16.gmra.mrb[4].mxu0 %v1211_v3  ;;  %v1088_v13 = vadd.f32 %v1056_v34, %v988_v7  ;;  %v573_v27 = vadd.f32 %v541_v40, %v472_v4  ;;  %v742_v33 = vmul.f32 %v2413_v9, %v1996_v47  ;;  %v842_v62 = vmul.f32 %v2502_v23, %v2001_v49 }
  0x69   : > { %v1089_v31 = vadd.f32 %v1057_v2, %v989_v10  ;;  %v574_v19 = vadd.f32 %v542_v28, %v473_v41  ;;  %v843_v58 = vmul.f32 %v2507_v38, %v2001_v49  ;;  %v942_v34 = vmul.f32 %v2512_v8, %v2012_v54 }
  0x6a   : > { %v1127_v56 = vmul.f32 %v2100_v6, %v1088_v13  ;;  %v673_v36 = vadd.f32 %v641_v45, %v573_v27  ;;  %v943_v51 = vmul.f32 %v2517_v57, %v2012_v54  ;;  %v1042_v2 = vmul.f32 %v1958_v26, %v2522_v5 }
  0x6b   : > { %v1128_v44 = vmul.f32 %v2100_v6, %v1089_v31  ;;  %v674_v24 = vadd.f32 %v642_v16, %v574_v19  ;;  %v1043_v42 = vmul.f32 %v1958_v26, %v2528_v63  ;;  %v288_v55 = vmul.f32 %v2328_v30, %v1936_v14 }
  0x6c   : > { %v1166_v60 = vadd.f32 %v2118_v20, %v1127_v56  ;;  %v773_v50 = vadd.f32 %v741_v15, %v673_v36  ;;  %v289_v59 = vmul.f32 %v2331_v37, %v1936_v14  ;;  %v356_v40 = vmul.f32 %v2340_v48, %v1940_v17  ;;  %v2562_v36 = vld [vmem:[%s1922_s29 + $0x150] sm:$0xff] }
  0x6d   : > { %v1167_v28 = vadd.f32 %v2118_v20, %v1128_v44  ;;  %v774_v3 = vadd.f32 %v742_v33, %v674_v24  ;;  %v357_v7 = vmul.f32 %v2345_v53, %v1940_v17  ;;  %v456_v4 = vmul.f32 %v2350_v29, %v1942_v18  ;;  %v2565_v44 = vld [vmem:[%s1922_s29 + $0x158] sm:$0xff] }
  0x6e   : > { %v1198_v45 = vmax.f32 %v1166_v60, 0.0  ;;  %v874_v30 = vadd.f32 %v842_v62, %v773_v50  ;;  %v388_v10 = vadd.f32 %v356_v40, %v288_v55  ;;  %v457_v41 = vmul.f32 %v2353_v32, %v1942_v18  ;;  %v2572_v60 = vld [vmem:[%s1922_s29 + $0x151] sm:$0xff]  ;;  %v2575_v50 = vld [vmem:[%s1922_s29 + $0x159] sm:$0xff] }
  0x6f   : > { %v1199_v16 = vmax.f32 %v1167_v28, 0.0  ;;  %v875_v37 = vadd.f32 %v843_v58, %v774_v3  ;;  %v389_v48 = vadd.f32 %v357_v7, %v289_v59  ;;  %v557_v15 = vmul.f32 %v2446_v1, %v1946_v21  ;;  %v2583_v3 = vld [vmem:[%s1922_s29 + $0x152] sm:$0xff]  ;;  %v2586_v7 = vld [vmem:[%s1922_s29 + $0x15a] sm:$0xff] }
  0x70   : > { %v974_v13 = vadd.f32 %v942_v34, %v874_v30  ;;  %v488_v27 = vadd.f32 %v456_v4, %v388_v10  ;;  %v558_v53 = vmul.f32 %v2449_v43, %v1946_v21  ;;  %v657_v29 = vmul.f32 %v2454_v25, %v1948_v22 }
  0x71   : > { %v1219_v33 = vpack.c.bf16 %v1199_v16, %v1198_v45  ;;  %v975_v32 = vadd.f32 %v943_v51, %v875_v37  ;;  %v489_v62 = vadd.f32 %v457_v41, %v389_v48  ;;  %v658_v31 = vmul.f32 %v2457_v46, %v1948_v22 }
  0x72   : > { %v1074_v19 = vadd.f32 %v1042_v2, %v974_v13  ;;  %v589_v58 = vadd.f32 %v557_v15, %v488_v27  ;;  %v757_v34 = vmul.f32 %v2466_v11, %v1996_v47  ;;  %v758_v56 = vmul.f32 %v2471_v12, %v1996_v47 }
  0x73   : > { %1811 = vmatmul.mubr.bf16.gmra.mrb[4].mxu1 %v1219_v33  ;;  %v1075_v51 = vadd.f32 %v1043_v42, %v975_v32  ;;  %v590_v24 = vadd.f32 %v558_v53, %v489_v62  ;;  %v858_v55 = vmul.f32 %v2562_v36, %v2001_v49  ;;  %v859_v2 = vmul.f32 %v2565_v44, %v2001_v49 }
  0x74   : > { %v1113_v59 = vmul.f32 %v2100_v6, %v1074_v19  ;;  %v689_v40 = vadd.f32 %v657_v29, %v589_v58  ;;  %v958_v28 = vmul.f32 %v2572_v60, %v2012_v54  ;;  %v959_v42 = vmul.f32 %v2575_v50, %v2012_v54 }
  0x75   : > { %v1114_v4 = vmul.f32 %v2100_v6, %v1075_v51  ;;  %v690_v45 = vadd.f32 %v658_v31, %v590_v24  ;;  %v1058_v30 = vmul.f32 %v1958_v26, %v2583_v3  ;;  %v1059_v10 = vmul.f32 %v1958_v26, %v2586_v7 }
  0x76   : > { %v1152_v41 = vadd.f32 %v2118_v20, %v1113_v59  ;;  %v789_v16 = vadd.f32 %v757_v34, %v689_v40  ;;  %v274_v37 = vmul.f32 %v2388_v52, %v1936_v14  ;;  %v275_v48 = vmul.f32 %v2391_v39, %v1936_v14  ;;  %v2620_v59 = vld [vmem:[%s1922_s29 + $0xa8] sm:$0xff] }
  0x77   : > { %v1153_v15 = vadd.f32 %v2118_v20, %v1114_v4  ;;  %v790_v13 = vadd.f32 %v758_v56, %v690_v45  ;;  %v342_v27 = vmul.f32 %v2396_v61, %v1940_v17  ;;  %v343_v53 = vmul.f32 %v2399_v0, %v1940_v17  ;;  %v2623_v4 = vld [vmem:[%s1922_s29 + $0xb0] sm:$0xff] }
  0x78   : > { %v1184_v29 = vmax.f32 %v1152_v41, 0.0  ;;  %v890_v26 = vadd.f32 %v858_v55, %v789_v16  ;;  %v442_v33 = vmul.f32 %v2409_v35, %v1942_v18  ;;  %v443_v52 = vmul.f32 %v2413_v9, %v1942_v18  ;;  %v2631_v41 = vld [vmem:[%s1922_s29 + $0xb1] sm:$0xff] }
  0x79   : > { %v1185_v32 = vmax.f32 %v1153_v15, 0.0  ;;  %v891_v39 = vadd.f32 %v859_v2, %v790_v13  ;;  %v374_v62 = vadd.f32 %v342_v27, %v274_v37  ;;  %v375_v31 = vadd.f32 %v343_v53, %v275_v48  ;;  %v2641_v15 = vld [vmem:[%s1922_s29 + $0xaa] sm:$0xff] }
  0x7a   : > { %v990_v19 = vadd.f32 %v958_v28, %v890_v26  ;;  %v543_v61 = vmul.f32 %v2502_v23, %v1946_v21  ;;  %v544_v0 = vmul.f32 %v2507_v38, %v1946_v21  ;;  %v643_v58 = vmul.f32 %v2512_v8, %v1948_v22  ;;  %v2650_v26 = vld [vmem:[%s2968_s1 + $0x8] ss:$0 sm:$0xff] }
  0x7b   : > { %v1212_v35 = vpack.c.bf16 %v1185_v32, %v1184_v29  ;;  %v991_v9 = vadd.f32 %v959_v42, %v891_v39  ;;  %v474_v34 = vadd.f32 %v442_v33, %v374_v62  ;;  %v475_v56 = vadd.f32 %v443_v52, %v375_v31  ;;  %v2645_v29 = vld [vmem:[%s1922_s29 + $0xb2] sm:$0xff] }
  0x7c   : > { %v1090_v51 = vadd.f32 %v1058_v30, %v990_v19  ;;  %v644_v24 = vmul.f32 %v2517_v57, %v1948_v22  ;;  %v743_v55 = vmul.f32 %v2522_v5, %v1996_v47  ;;  %v744_v2 = vmul.f32 %v2528_v63, %v1996_v47  ;;  %v2628_v30 = vld [vmem:[%s1922_s29 + $0xa9] sm:$0xff] }
  0x7d   : > { %1798 = vmatprep.mubr.bf16.mxu0 %v1212_v35  ;;  %v1091_v40 = vadd.f32 %v1059_v10, %v991_v9  ;;  %v575_v28 = vadd.f32 %v543_v61, %v474_v34  ;;  %v576_v42 = vadd.f32 %v544_v0, %v475_v56  ;;  %v844_v45 = vmul.f32 %v2620_v59, %v2001_v49 }
  0x7e   : > { %v1129_v16 = vmul.f32 %v2100_v6, %v1090_v51  ;;  %v845_v37 = vmul.f32 %v2623_v4, %v2001_v49  ;;  %v944_v48 = vmul.f32 %v2628_v30, %v2012_v54  ;;  %v945_v10 = vmul.f32 %v2631_v41, %v2012_v54 }
  0x7f   : > { %v1130_v13 = vmul.f32 %v2100_v6, %v1091_v40  ;;  %v675_v27 = vadd.f32 %v643_v58, %v575_v28  ;;  %v676_v53 = vadd.f32 %v644_v24, %v576_v42  ;;  %v1044_v33 = vmul.f32 %v2650_v26, %v2641_v15 }
  0x80   : > { %v1168_v52 = vadd.f32 %v2118_v20, %v1129_v16  ;;  %v1045_v32 = vmul.f32 %v2650_v26, %v2645_v29  ;;  %v290_v39 = vmul.f32 %v2446_v1, %v1936_v14  ;;  %v291_v62 = vmul.f32 %v2449_v43, %v1936_v14 }
  0x81   : > { %v1169_v31 = vadd.f32 %v2118_v20, %v1130_v13  ;;  %v775_v19 = vadd.f32 %v743_v55, %v675_v27  ;;  %v776_v61 = vadd.f32 %v744_v2, %v676_v53  ;;  %v358_v0 = vmul.f32 %v2454_v25, %v1940_v17 }
  0x82   : > { %v1200_v58 = vmax.f32 %v1168_v52, 0.0  ;;  %v359_v35 = vmul.f32 %v2457_v46, %v1940_v17  ;;  %v458_v9 = vmul.f32 %v2466_v11, %v1942_v18  ;;  %v459_v1 = vmul.f32 %v2471_v12, %v1942_v18  ;;  %v2691_v52 = vld [vmem:[%s1922_s29 + $0x169] sm:$0xff] }
  0x83   : > { %v1201_v34 = vmax.f32 %v1169_v31, 0.0  ;;  %v876_v43 = vadd.f32 %v844_v45, %v775_v19  ;;  %v877_v56 = vadd.f32 %v845_v37, %v776_v61  ;;  %v390_v51 = vadd.f32 %v358_v0, %v290_v39  ;;  %v2683_v37 = vld [vmem:[%s1922_s29 + $0x168] sm:$0xff]  ;;  %v2694_v39 = vld [vmem:[%s1922_s29 + $0x171] sm:$0xff] }
  0x84   : > { %v391_v24 = vadd.f32 %v359_v35, %v291_v62  ;;  %v559_v55 = vmul.f32 %v2562_v36, %v1946_v21  ;;  %v560_v25 = vmul.f32 %v2565_v44, %v1946_v21  ;;  %v659_v46 = vmul.f32 %v2572_v60, %v1948_v22  ;;  %v2708_v35 = vld [vmem:[%s1922_s29 + $0x172] sm:$0xff] }
  0x85   : > { %v1220_v11 = vpack.c.bf16 %v1201_v34, %v1200_v58  ;;  %v976_v12 = vadd.f32 %v944_v48, %v876_v43  ;;  %v977_v2 = vadd.f32 %v945_v10, %v877_v56  ;;  %v490_v40 = vadd.f32 %v458_v9, %v390_v51  ;;  %v2686_v10 = vld [vmem:[%s1922_s29 + $0x170] sm:$0xff] }
  0x86   : > { %v491_v28 = vadd.f32 %v459_v1, %v391_v24  ;;  %v660_v42 = vmul.f32 %v2575_v50, %v1948_v22  ;;  %v759_v45 = vmul.f32 %v2583_v3, %v1996_v47  ;;  %v760_v16 = vmul.f32 %v2586_v7, %v1996_v47 }
  0x87   : > { %1814 = vmatprep.mubr.bf16.mxu1 %v1220_v11  ;;  %v1076_v13 = vadd.f32 %v1044_v33, %v976_v12  ;;  %v1077_v27 = vadd.f32 %v1045_v32, %v977_v2  ;;  %v591_v48 = vadd.f32 %v559_v55, %v490_v40  ;;  %v860_v53 = vmul.f32 %v2683_v37, %v2001_v49  ;;  %v2703_v32 = vld [vmem:[%s1922_s29 + $0x16a] sm:$0xff] }
  0x88   : > { %v592_v62 = vadd.f32 %v560_v25, %v491_v28  ;;  %v861_v31 = vmul.f32 %v2686_v10, %v2001_v49  ;;  %v960_v19 = vmul.f32 %v2691_v52, %v2012_v54  ;;  %v961_v33 = vmul.f32 %v2694_v39, %v2012_v54 }
  0x89   : > { %v1115_v61 = vmul.f32 %v2100_v6, %v1076_v13  ;;  %v1116_v0 = vmul.f32 %v2100_v6, %v1077_v27  ;;  %v691_v58 = vadd.f32 %v659_v46, %v591_v48  ;;  %v1060_v9 = vmul.f32 %v2650_v26, %v2703_v32 }
  0x8a   : > { %v692_v1 = vadd.f32 %v660_v42, %v592_v62  ;;  %v1061_v34 = vmul.f32 %v2650_v26, %v2708_v35  ;;  %v276_v43 = vmul.f32 %v2502_v23, %v1936_v14  ;;  %v277_v56 = vmul.f32 %v2507_v38, %v1936_v14 }
  0x8b   : > { %v1154_v51 = vadd.f32 %v2118_v20, %v1115_v61  ;;  %v1155_v6 = vadd.f32 %v2118_v20, %v1116_v0  ;;  %v791_v24 = vadd.f32 %v759_v45, %v691_v58  ;;  %v344_v55 = vmul.f32 %v2512_v8, %v1940_v17  ;;  %v2744_v61 = vld [vmem:[%s1922_s29 + $0xc8] sm:$0xff] }
  0x8c   : > { %v792_v25 = vadd.f32 %v760_v16, %v692_v1  ;;  %v345_v46 = vmul.f32 %v2517_v57, %v1940_v17  ;;  %v444_v11 = vmul.f32 %v2522_v5, %v1942_v18  ;;  %v445_v23 = vmul.f32 %v2528_v63, %v1942_v18  ;;  %v2749_v0 = vld [vmem:[%s1922_s29 + $0xc1] sm:$0xff] }
  0x8d   : > { %v1186_v12 = vmax.f32 %v1154_v51, 0.0  ;;  %v1187_v38 = vmax.f32 %v1155_v6, 0.0  ;;  %v892_v2 = vadd.f32 %v860_v53, %v791_v24  ;;  %v376_v40 = vadd.f32 %v344_v55, %v276_v43  ;;  %v2739_v53 = vld [vmem:[%s1922_s29 + $0xc0] sm:$0xff] }
  0x8e   : > { %v893_v20 = vadd.f32 %v861_v31, %v792_v25  ;;  %v377_v28 = vadd.f32 %v345_v46, %v277_v56  ;;  %v545_v8 = vmul.f32 %v2620_v59, %v1946_v21  ;;  %v546_v57 = vmul.f32 %v2623_v4, %v1946_v21  ;;  %v2754_v56 = vld [vmem:[%s1922_s29 + $0xc9] sm:$0xff]  ;;  %v2764_v6 = vld [vmem:[%s2969_s2] ss:$0 sm:$0xff] }
  0x8f   : > { %v1213_v42 = vpack.c.bf16 %v1187_v38, %v1186_v12  ;;  %v992_v5 = vadd.f32 %v960_v19, %v892_v2  ;;  %v476_v45 = vadd.f32 %v444_v11, %v376_v40  ;;  %v645_v63 = vmul.f32 %v2628_v30, %v1948_v22  ;;  %v2759_v51 = vld [vmem:[%s1922_s29 + $0xc2] sm:$0xff]  ;;  %v2770_v25 = vld [vmem:[%s1922_s29 + $0xca] sm:$0xff]  ;;  %v2782_v2 = vld [vmem:[%s2970_s3] ss:$0 sm:$0xff] }
  0x90   : > { %v993_v16 = vadd.f32 %v961_v33, %v893_v20  ;;  %v477_v13 = vadd.f32 %v445_v23, %v377_v28  ;;  %v646_v27 = vmul.f32 %v2631_v41, %v1948_v22  ;;  %v745_v48 = vmul.f32 %v2641_v15, %v1996_v47 }
  0x91   : > { %1799 = vmatmul.mubr.bf16.gmra.mrb[8].mxu0 %v1213_v42  ;;  %v1092_v62 = vadd.f32 %v1060_v9, %v992_v5  ;;  %v577_v31 = vadd.f32 %v545_v8, %v476_v45  ;;  %v746_v19 = vmul.f32 %v2645_v29, %v1996_v47  ;;  %v846_v33 = vmul.f32 %v2739_v53, %v2001_v49 }
  0x92   : > { %v1093_v58 = vadd.f32 %v1061_v34, %v993_v16  ;;  %v578_v1 = vadd.f32 %v546_v57, %v477_v13  ;;  %v847_v43 = vmul.f32 %v2744_v61, %v2001_v49  ;;  %v946_v9 = vmul.f32 %v2749_v0, %v2012_v54 }
  0x93   : > { %v1131_v24 = vmul.f32 %v2764_v6, %v1092_v62  ;;  %v677_v55 = vadd.f32 %v645_v63, %v577_v31  ;;  %v947_v34 = vmul.f32 %v2754_v56, %v2012_v54  ;;  %v1046_v46 = vmul.f32 %v2650_v26, %v2759_v51 }
  0x94   : > { %v1132_v11 = vmul.f32 %v2764_v6, %v1093_v58  ;;  %v678_v23 = vadd.f32 %v646_v27, %v578_v1  ;;  %v1047_v12 = vmul.f32 %v2650_v26, %v2770_v25  ;;  %v292_v38 = vmul.f32 %v2562_v36, %v1936_v14 }
  0x95   : > { %v1170_v40 = vadd.f32 %v2782_v2, %v1131_v24  ;;  %v777_v20 = vadd.f32 %v745_v48, %v677_v55  ;;  %v293_v28 = vmul.f32 %v2565_v44, %v1936_v14  ;;  %v360_v8 = vmul.f32 %v2572_v60, %v1940_v17  ;;  %v2809_v55 = vld [vmem:[%s1922_s29 + $0x180] sm:$0xff] }
  0x96   : > { %v1171_v57 = vadd.f32 %v2782_v2, %v1132_v11  ;;  %v778_v42 = vadd.f32 %v746_v19, %v678_v23  ;;  %v361_v36 = vmul.f32 %v2575_v50, %v1940_v17  ;;  %v460_v5 = vmul.f32 %v2583_v3, %v1942_v18  ;;  %v2812_v11 = vld [vmem:[%s1922_s29 + $0x188] sm:$0xff] }
  0x97   : > { %v1202_v45 = vmax.f32 %v1170_v40, 0.0  ;;  %v878_v63 = vadd.f32 %v846_v33, %v777_v20  ;;  %v392_v16 = vadd.f32 %v360_v8, %v292_v38  ;;  %v461_v13 = vmul.f32 %v2586_v7, %v1942_v18  ;;  %v2819_v40 = vld [vmem:[%s1922_s29 + $0x181] sm:$0xff]  ;;  %v2822_v20 = vld [vmem:[%s1922_s29 + $0x189] sm:$0xff] }
  0x98   : > { %v1203_v27 = vmax.f32 %v1171_v57, 0.0  ;;  %v879_v44 = vadd.f32 %v847_v43, %v778_v42  ;;  %v393_v60 = vadd.f32 %v361_v36, %v293_v28  ;;  %v561_v48 = vmul.f32 %v2683_v37, %v1946_v21  ;;  %v2830_v42 = vld [vmem:[%s1922_s29 + $0x182] sm:$0xff]  ;;  %v2833_v36 = vld [vmem:[%s1922_s29 + $0x18a] sm:$0xff] }
  0x99   : > { %v978_v62 = vadd.f32 %v946_v9, %v878_v63  ;;  %v492_v31 = vadd.f32 %v460_v5, %v392_v16  ;;  %v562_v50 = vmul.f32 %v2686_v10, %v1946_v21  ;;  %v661_v3 = vmul.f32 %v2691_v52, %v1948_v22 }
  0x9a   : > { %v1221_v19 = vpack.c.bf16 %v1203_v27, %v1202_v45  ;;  %v979_v7 = vadd.f32 %v947_v34, %v879_v44  ;;  %v493_v33 = vadd.f32 %v461_v13, %v393_v60  ;;  %v662_v58 = vmul.f32 %v2694_v39, %v1948_v22 }
  0x9b   : > { %v1078_v1 = vadd.f32 %v1046_v46, %v978_v62  ;;  %v593_v43 = vadd.f32 %v561_v48, %v492_v31  ;;  %v761_v9 = vmul.f32 %v2703_v32, %v1996_v47  ;;  %v762_v24 = vmul.f32 %v2708_v35, %v1996_v47 }
  0x9c   : > { %1815 = vmatmul.mubr.bf16.gmra.mrb[8].mxu1 %v1221_v19  ;;  %v1079_v34 = vadd.f32 %v1047_v12, %v979_v7  ;;  %v594_v23 = vadd.f32 %v562_v50, %v493_v33  ;;  %v862_v38 = vmul.f32 %v2809_v55, %v2001_v49  ;;  %v863_v46 = vmul.f32 %v2812_v11, %v2001_v49 }
  0x9d   : > { %v1117_v28 = vmul.f32 %v2764_v6, %v1078_v1  ;;  %v693_v8 = vadd.f32 %v661_v3, %v593_v43  ;;  %v962_v57 = vmul.f32 %v2819_v40, %v2012_v54  ;;  %v963_v12 = vmul.f32 %v2822_v20, %v2012_v54 }
  0x9e   : > { %v1118_v5 = vmul.f32 %v2764_v6, %v1079_v34  ;;  %v694_v45 = vadd.f32 %v662_v58, %v594_v23  ;;  %v1062_v63 = vmul.f32 %v2650_v26, %v2830_v42  ;;  %v1063_v16 = vmul.f32 %v2650_v26, %v2833_v36 }
  0x9f   : > { %v1156_v13 = vadd.f32 %v2782_v2, %v1117_v28  ;;  %v793_v27 = vadd.f32 %v761_v9, %v693_v8  ;;  %v278_v44 = vmul.f32 %v2620_v59, %v1936_v14  ;;  %v279_v60 = vmul.f32 %v2623_v4, %v1936_v14  ;;  %v1654_v9 = vld [vmem:[%s1922_s29 + $0xd8] sm:$0xff]  ;;  %v1687_v28 = vld [vmem:[%s1922_s29 + $0xe1] sm:$0xff] }
  0xa0   : > { %v1157_v48 = vadd.f32 %v2782_v2, %v1118_v5  ;;  %v794_v62 = vadd.f32 %v762_v24, %v694_v45  ;;  %v346_v31 = vmul.f32 %v2628_v30, %v1940_v17  ;;  %v347_v50 = vmul.f32 %v2631_v41, %v1940_v17 }
  0xa1   : > { %v1188_v3 = vmax.f32 %v1156_v13, 0.0  ;;  %v894_v19 = vadd.f32 %v862_v38, %v793_v27  ;;  %v446_v7 = vmul.f32 %v2641_v15, %v1942_v18  ;;  %v447_v59 = vmul.f32 %v2645_v29, %v1942_v18  ;;  %v1655_v38 = vld [vmem:[%s1922_s29 + $0xe0] sm:$0xff] }
  0xa2   : > { %v1189_v4 = vmax.f32 %v1157_v48, 0.0  ;;  %v895_v33 = vadd.f32 %v863_v46, %v794_v62  ;;  %v378_v58 = vadd.f32 %v346_v31, %v278_v44  ;;  %v379_v1 = vadd.f32 %v347_v50, %v279_v60  ;;  %v1686_v46 = vld [vmem:[%s1922_s29 + $0xd9] sm:$0xff]  ;;  %v1719_v27 = vld [vmem:[%s1922_s29 + $0xe2] sm:$0xff] }
  0xa3   : > { %v994_v43 = vadd.f32 %v962_v57, %v894_v19  ;;  %v547_v30 = vmul.f32 %v2739_v53, %v1946_v21  ;;  %v548_v41 = vmul.f32 %v2744_v61, %v1946_v21  ;;  %v647_v15 = vmul.f32 %v2749_v0, %v1948_v22  ;;  %v1718_v0 = vld [vmem:[%s1922_s29 + $0xda] sm:$0xff] }
  0xa4   : > { %v1214_v24 = vpack.c.bf16 %v1189_v4, %v1188_v3  ;;  %v995_v34 = vadd.f32 %v963_v12, %v895_v33  ;;  %v478_v29 = vadd.f32 %v446_v7, %v378_v58  ;;  %v479_v23 = vadd.f32 %v447_v59, %v379_v1 }
  0xa5   : > { %v1094_v8 = vadd.f32 %v1062_v63, %v994_v43  ;;  %v648_v57 = vmul.f32 %v2754_v56, %v1948_v22  ;;  %v747_v53 = vmul.f32 %v2759_v51, %v1996_v47  ;;  %v748_v61 = vmul.f32 %v2770_v25, %v1996_v47 }
  0xa6   : > { %1802 = vmatprep.mubr.bf16.mxu0 %v1214_v24  ;;  %v1095_v5 = vadd.f32 %v1063_v16, %v995_v34  ;;  %v579_v12 = vadd.f32 %v547_v30, %v478_v29  ;;  %v580_v45 = vadd.f32 %v548_v41, %v479_v23  ;;  %v848_v13 = vmul.f32 %v1654_v9, %v2001_v49  ;;  %v1670_v34 = vld [vmem:[%s1922_s29 + $0x198] sm:$0xff] }
  0xa7   : > { %v1133_v44 = vmul.f32 %v2764_v6, %v1094_v8  ;;  %v849_v63 = vmul.f32 %v1655_v38, %v2001_v49  ;;  %v948_v56 = vmul.f32 %v1686_v46, %v2012_v54  ;;  %v949_v60 = vmul.f32 %v1687_v28, %v2012_v54  ;;  %v1702_v46 = vld [vmem:[%s1922_s29 + $0x199] sm:$0xff] }
  0xa8   : > { %v1134_v51 = vmul.f32 %v2764_v6, %v1095_v5  ;;  %v679_v48 = vadd.f32 %v647_v15, %v579_v12  ;;  %v680_v25 = vadd.f32 %v648_v57, %v580_v45  ;;  %v1048_v62 = vmul.f32 %v2650_v26, %v1718_v0  ;;  %v1703_v57 = vld [vmem:[%s1922_s29 + $0x1a1] sm:$0xff] }
  0xa9   : > { %v1172_v16 = vadd.f32 %v2782_v2, %v1133_v44  ;;  %v1049_v31 = vmul.f32 %v2650_v26, %v1719_v27  ;;  %v294_v50 = vmul.f32 %v2683_v37, %v1936_v14  ;;  %v295_v3 = vmul.f32 %v2686_v10, %v1936_v14  ;;  %v1734_v0 = vld [vmem:[%s1922_s29 + $0x19a] sm:$0xff] }
  0xaa   : > { %v1173_v19 = vadd.f32 %v2782_v2, %v1134_v51  ;;  %v779_v7 = vadd.f32 %v747_v53, %v679_v48  ;;  %v780_v59 = vadd.f32 %v748_v61, %v680_v25  ;;  %v362_v4 = vmul.f32 %v2691_v52, %v1940_v17 }
  0xab   : > { %v1204_v33 = vmax.f32 %v1172_v16, 0.0  ;;  %v363_v58 = vmul.f32 %v2694_v39, %v1940_v17  ;;  %v462_v1 = vmul.f32 %v2703_v32, %v1942_v18  ;;  %v463_v37 = vmul.f32 %v2708_v35, %v1942_v18 }
  0xac   : > { %v1205_v43 = vmax.f32 %v1173_v19, 0.0  ;;  %v880_v14 = vadd.f32 %v848_v13, %v779_v7  ;;  %v881_v10 = vadd.f32 %v849_v63, %v780_v59  ;;  %v394_v30 = vadd.f32 %v362_v4, %v294_v50 }
  0xad   : > { %v395_v41 = vadd.f32 %v363_v58, %v295_v3  ;;  %v563_v52 = vmul.f32 %v2809_v55, %v1946_v21  ;;  %v564_v15 = vmul.f32 %v2812_v11, %v1946_v21  ;;  %v663_v17 = vmul.f32 %v2819_v40, %v1948_v22  ;;  %v1671_v11 = vld [vmem:[%s1922_s29 + $0x1a0] sm:$0xff] }
  0xae   : > { %v1222_v39 = vpack.c.bf16 %v1205_v43, %v1204_v33  ;;  %v980_v32 = vadd.f32 %v948_v56, %v880_v14  ;;  %v981_v9 = vadd.f32 %v949_v60, %v881_v10  ;;  %v494_v18 = vadd.f32 %v462_v1, %v394_v30 }
  0xaf   : > { %v495_v35 = vadd.f32 %v463_v37, %v395_v41  ;;  %v664_v24 = vmul.f32 %v2822_v20, %v1948_v22  ;;  %v763_v21 = vmul.f32 %v2830_v42, %v1996_v47  ;;  %v764_v38 = vmul.f32 %v2833_v36, %v1996_v47  ;;  %v1735_v36 = vld [vmem:[%s1922_s29 + $0x1a2] sm:$0xff]  ;;  %s1749_s29 = sshll.u32 %s2974_s19, 8 }
  0xb0   : > { %1818 = vmatprep.mubr.bf16.mxu1 %v1222_v39  ;;  %v1080_v55 = vadd.f32 %v1048_v62, %v980_v32  ;;  %v1081_v29 = vadd.f32 %v1049_v31, %v981_v9  ;;  %v595_v23 = vadd.f32 %v563_v52, %v494_v18  ;;  %v864_v8 = vmul.f32 %v1670_v34, %v2001_v49  ;;  %s2930_s9 = scalar_lea.vmem %s2972_s5, %s1749_s29 }
  0xb1   : > { %v596_v40 = vadd.f32 %v564_v15, %v495_v35  ;;  %v865_v61 = vmul.f32 %v1671_v11, %v2001_v49  ;;  %v964_v47 = vmul.f32 %v1702_v46, %v2012_v54  ;;  %v965_v13 = vmul.f32 %v1703_v57, %v2012_v54 }
  0xb2   : > { %v1119_v28 = vmul.f32 %v2764_v6, %v1080_v55  ;;  %v1120_v22 = vmul.f32 %v2764_v6, %v1081_v29  ;;  %v695_v20 = vadd.f32 %v663_v17, %v595_v23  ;;  %v1064_v56 = vmul.f32 %v2650_v26, %v1734_v0 }
  0xb3   : > { %v696_v53 = vadd.f32 %v664_v24, %v596_v40  ;;  %v1065_v49 = vmul.f32 %v2650_v26, %v1735_v36 }
  0xb4   : > { %v1158_v42 = vadd.f32 %v2782_v2, %v1119_v28  ;;  %v1159_v5 = vadd.f32 %v2782_v2, %v1120_v22  ;;  %v795_v12 = vadd.f32 %v763_v21, %v695_v20 }
  0xb5   : > { %v796_v45 = vadd.f32 %v764_v38, %v696_v53 }
  0xb6   : > { %v1190_v27 = vmax.f32 %v1158_v42, 0.0  ;;  %v1191_v44 = vmax.f32 %v1159_v5, 0.0  ;;  %v896_v63 = vadd.f32 %v864_v8, %v795_v12 }
  0xb7   : > { %v897_v60 = vadd.f32 %v865_v61, %v796_v45 }
  0xb8   : > { %v1215_v51 = vpack.c.bf16 %v1191_v44, %v1190_v27  ;;  %v996_v48 = vadd.f32 %v964_v47, %v896_v63 }
  0xb9   : > { %v997_v25 = vadd.f32 %v965_v13, %v897_v60 }
  0xba   : > { %1803 = vmatmul.mubr.bf16.gmra.mrb[12].mxu0 %v1215_v51  ;;  %v1096_v62 = vadd.f32 %v1064_v56, %v996_v48 }
  0xbb   : > { %v1097_v16 = vadd.f32 %v1065_v49, %v997_v25 }
  0xbc   : > { %v1135_v31 = vmul.f32 %v2764_v6, %v1096_v62 }
  0xbd   : > { %v1136_v50 = vmul.f32 %v2764_v6, %v1097_v16 }
  0xbe   : > { %v1174_v54 = vadd.f32 %v2782_v2, %v1135_v31 }
  0xbf   : > { %v1175_v3 = vadd.f32 %v2782_v2, %v1136_v50 }
  0xc0   : > { %v1206_v19 = vmax.f32 %v1174_v54, 0.0 }
  0xc1   : > { %v1207_v7 = vmax.f32 %v1175_v3, 0.0 }
  0xc3   : > { %v1223_v59 = vpack.c.bf16 %v1207_v7, %v1206_v19 }
  0xc5   : > { %1819 = vmatmul.mubr.bf16.gmra.mrb[12].mxu1 %v1223_v59 }
 0x112   : > { %v1792_v26 = vpop.f32.mrb[0].mxu0 }
 0x113   : > { %1451 = vst [vmem:[%s2930_s9 + $0x10] sm:$0xff] %v1792_v26  ;;  %v1322_v6 = vpop.f32.mrb[1].mxu0 }
 0x114   : > { %1449 = vst [vmem:[%s2930_s9] sm:$0xff] %v1322_v6  ;;  %v1793_v2 = vpop.f32.mrb[2].mxu0 }
 0x115   : > { %1452 = vst [vmem:[%s2930_s9 + $0x18] sm:$0xff] %v1793_v2  ;;  %v1325_v4 = vpop.f32.mrb[3].mxu0 }
 0x116   : > { %1450 = vst [vmem:[%s2930_s9 + $0x8] sm:$0xff] %v1325_v4 }
 0x11d   : > { %v1808_v33 = vpop.f32.mrb[0].mxu1 }
 0x11e   : > { %1467 = vst [vmem:[%s2930_s9 + $0x90] sm:$0xff] %v1808_v33  ;;  %v1386_v58 = vpop.f32.mrb[1].mxu1 }
 0x11f   : > { %1465 = vst [vmem:[%s2930_s9 + $0x80] sm:$0xff] %v1386_v58  ;;  %v1809_v1 = vpop.f32.mrb[2].mxu1 }
 0x120   : > { %1468 = vst [vmem:[%s2930_s9 + $0x98] sm:$0xff] %v1809_v1  ;;  %v1389_v37 = vpop.f32.mrb[3].mxu1 }
 0x121   : > { %1466 = vst [vmem:[%s2930_s9 + $0x88] sm:$0xff] %v1389_v37 }
 0x13b   : > { %v1796_v43 = vpop.f32.mrb[4].mxu0 }
 0x13c   : > { %1455 = vst [vmem:[%s2930_s9 + $0x30] sm:$0xff] %v1796_v43  ;;  %v1338_v14 = vpop.f32.mrb[5].mxu0 }
 0x13d   : > { %1453 = vst [vmem:[%s2930_s9 + $0x20] sm:$0xff] %v1338_v14  ;;  %v1797_v10 = vpop.f32.mrb[6].mxu0 }
 0x13e   : > { %1456 = vst [vmem:[%s2930_s9 + $0x38] sm:$0xff] %v1797_v10  ;;  %v1341_v30 = vpop.f32.mrb[7].mxu0 }
 0x13f   : > { %1454 = vst [vmem:[%s2930_s9 + $0x28] sm:$0xff] %v1341_v30 }
 0x146   : > { %v1812_v41 = vpop.f32.mrb[4].mxu1 }
 0x147   : > { %1471 = vst [vmem:[%s2930_s9 + $0xb0] sm:$0xff] %v1812_v41  ;;  %v1402_v52 = vpop.f32.mrb[5].mxu1 }
 0x148   : > { %1469 = vst [vmem:[%s2930_s9 + $0xa0] sm:$0xff] %v1402_v52  ;;  %v1813_v15 = vpop.f32.mrb[6].mxu1 }
 0x149   : > { %1472 = vst [vmem:[%s2930_s9 + $0xb8] sm:$0xff] %v1813_v15  ;;  %v1405_v17 = vpop.f32.mrb[7].mxu1 }
 0x14a   : > { %1470 = vst [vmem:[%s2930_s9 + $0xa8] sm:$0xff] %v1405_v17 }
 0x164   : > { %v1800_v39 = vpop.f32.mrb[8].mxu0 }
 0x165   : > { %1459 = vst [vmem:[%s2930_s9 + $0x50] sm:$0xff] %v1800_v39  ;;  %v1354_v32 = vpop.f32.mrb[9].mxu0 }
 0x166   : > { %1457 = vst [vmem:[%s2930_s9 + $0x40] sm:$0xff] %v1354_v32  ;;  %v1801_v9 = vpop.f32.mrb[10].mxu0 }
 0x167   : > { %1460 = vst [vmem:[%s2930_s9 + $0x58] sm:$0xff] %v1801_v9  ;;  %v1357_v18 = vpop.f32.mrb[11].mxu0 }
 0x168   : > { %1458 = vst [vmem:[%s2930_s9 + $0x48] sm:$0xff] %v1357_v18 }
 0x16f   : > { %v1816_v35 = vpop.f32.mrb[8].mxu1 }
 0x170   : > { %1475 = vst [vmem:[%s2930_s9 + $0xd0] sm:$0xff] %v1816_v35  ;;  %v1418_v24 = vpop.f32.mrb[9].mxu1 }
 0x171   : > { %1473 = vst [vmem:[%s2930_s9 + $0xc0] sm:$0xff] %v1418_v24  ;;  %v1817_v34 = vpop.f32.mrb[10].mxu1 }
 0x172   : > { %1476 = vst [vmem:[%s2930_s9 + $0xd8] sm:$0xff] %v1817_v34  ;;  %v1421_v55 = vpop.f32.mrb[11].mxu1 }
 0x173   : > { %1474 = vst [vmem:[%s2930_s9 + $0xc8] sm:$0xff] %v1421_v55 }
 0x18d   : > { %v1804_v29 = vpop.f32.mrb[12].mxu0 }
 0x18e   : > { %1463 = vst [vmem:[%s2930_s9 + $0x70] sm:$0xff] %v1804_v29  ;;  %v1370_v23 = vpop.f32.mrb[13].mxu0 }
 0x18f   : > { %1461 = vst [vmem:[%s2930_s9 + $0x60] sm:$0xff] %v1370_v23  ;;  %v1805_v21 = vpop.f32.mrb[14].mxu0 }
 0x190   : > { %1464 = vst [vmem:[%s2930_s9 + $0x78] sm:$0xff] %v1805_v21  ;;  %v1373_v11 = vpop.f32.mrb[15].mxu0 }
 0x191   : > { %1462 = vst [vmem:[%s2930_s9 + $0x68] sm:$0xff] %v1373_v11 }
 0x198   : > { %v1820_v40 = vpop.f32.mrb[12].mxu1 }
 0x199   : > { %1479 = vst [vmem:[%s2930_s9 + $0xf0] sm:$0xff] %v1820_v40  ;;  %v1434_v38 = vpop.f32.mrb[13].mxu1 }
 0x19a   : > { %1477 = vst [vmem:[%s2930_s9 + $0xe0] sm:$0xff] %v1434_v38  ;;  %v1821_v46 = vpop.f32.mrb[14].mxu1 }
 0x19b   : > { %1480 = vst [vmem:[%s2930_s9 + $0xf8] sm:$0xff] %v1821_v46  ;;  %v1437_v28 = vpop.f32.mrb[15].mxu1 }
 0x19c   : > { %1478 = vst [vmem:[%s2930_s9 + $0xe8] sm:$0xff] %v1437_v28 }
 0x19d PF: > { %s15_s18 = sadd.s32 1, %s1864_s18  }
 0x19e   : > { %p12_p4 = scmp.ge.s32.totalorder %s15_s18, 4  }
 0x1a0   :  { %14 = sbr.rel (!%p12_p4) target bundleno = 1 (0x1), region = 72 }

</bundles_post_ra>
